<compile_context>
chip_gen: v7x
topology: tpu7x:2x2x1
jax: 0.10.0
libtpu: 0.0.40
codegen_flags: <defaults>
</compile_context>

<pallas_src>
import math

import jax
import jax.numpy as jnp
from jax.experimental import pallas as pl
from jax.experimental.pallas import tpu as pltpu


MATMUL_DTYPE = jnp.bfloat16      # MXU operand dtype; f32 accumulation everywhere
ACT_DTYPE = jnp.bfloat16         # inter-layer activation dtype (halves HBM traffic)
OC_ALIGN = 16                    # conv out-channel padding (bf16 sublane packing)
K_ALIGN = 16                     # contraction-dim padding for bf16 operands
FC_K1_PAD = 512                  # fc1 contraction 400 -> 512 (lane-dense W rows)
FC_H_PAD = 128                   # hidden dims 120/84 -> 128 (in-register only)
FC_OUT_PAD = 16                  # logits 10 -> 16 rows (NOT 128: no useful work)
VMEM_LIMIT = 32 * 1024 * 1024    # fits all tiles below with headroom on every gen


def _round_up(a, m):
    return (a + m - 1) // m * m


def _pick_lane_tile(n, max_tile):
    """Lane-dim tile: multiple of 128, <= max_tile, and (when n allows) small
    enough that the 'parallel' grid axis has length >= 2 so both v7x
    TensorCores get work.  On v5e/v6e this only affects tile sizing."""
    t = _round_up((n + 1) // 2, 128)
    return max(128, min(max_tile, t))


# ----------------------------- Pallas kernels ------------------------------

def _conv_pool_kernel(q00_ref, q01_ref, q10_ref, q11_ref, w_ref, b_ref, o_ref):
    """Fused conv-as-GEMM + bias + ReLU + 2x2/stride-2 max-pool.

    q??_ref : [K, TM]   bf16  im2col patches of one pool quadrant
    w_ref   : [OC, K]   bf16  conv weight reshaped to (OC, C*KH*KW), zero-padded
    b_ref   : [OC, 1]   f32   bias (zero-padded)
    o_ref   : [OC, TM]  bf16  pooled activations; lane dim = M = (py, px, n)
    """
    w = w_ref[...]

    def quad(q_ref):
        return jnp.dot(w, q_ref[...], preferred_element_type=jnp.float32)

    # max over the 4 pool taps commutes with the per-channel bias add and the
    # monotonic ReLU, so this equals maxpool2x2(relu(conv(x) + b)).
    y = jnp.maximum(jnp.maximum(quad(q00_ref), quad(q01_ref)),
                    jnp.maximum(quad(q10_ref), quad(q11_ref)))
    o_ref[...] = jnp.maximum(y + b_ref[...], 0.0).astype(o_ref.dtype)


def _fc_stack_kernel(x_ref, w1_ref, b1_ref, w2_ref, b2_ref, w3_ref, b3_ref,
                     o_ref):
    """fc1 -> ReLU -> fc2 -> ReLU -> fc3 on transposed activations (one call).

    x_ref : [512, TN] bf16  conv features, feature-major / batch-minor (x^T)
    w*    : bf16, 0/1 dropout masks folded into input columns, zero-padded
    o_ref : [16, TN]  f32   logits^T (rows 10..15 are zero padding)
    """
    h = jnp.dot(w1_ref[...], x_ref[...], preferred_element_type=jnp.float32)
    h = jnp.maximum(h + b1_ref[...], 0.0)
    h = jnp.dot(w2_ref[...], h.astype(MATMUL_DTYPE),
                preferred_element_type=jnp.float32)
    h = jnp.maximum(h + b2_ref[...], 0.0)
    h = jnp.dot(w3_ref[...], h.astype(MATMUL_DTYPE),
                preferred_element_type=jnp.float32)
    o_ref[...] = (h + b3_ref[...]).astype(o_ref.dtype)


# ------------------------------- wrappers -----------------------------------

def _quadrant_patches(x_chwn, c_in, kh, kw, k_pad):
    """x_chwn: [C_store>=c_in, H, W, N] -> four [k_pad, ph*pw*N] bf16 patch
    matrices (one per 2x2 pool tap).  The GEMM M axis is ordered (py, px, n)
    so downstream layers consume conv outputs with plain reshapes only."""
    _, H, W, N = x_chwn.shape
    oh, ow = H - kh + 1, W - kw + 1
    ph, pw = oh // 2, ow // 2
    K = c_in * kh * kw
    quads = []
    for di in range(2):
        for dj in range(2):
            taps = []
            for c in range(c_in):           # (c, i, j) ordering matches
                for i in range(kh):         # torch's weight.reshape(OC, C*KH*KW)
                    for j in range(kw):
                        r, s = i + di, j + dj
                        taps.append(x_chwn[c,
                                           r:r + 2 * (ph - 1) + 1:2,
                                           s:s + 2 * (pw - 1) + 1:2, :])
            p = jnp.stack(taps, axis=0).reshape(K, ph * pw * N)
            p = jnp.pad(p, ((0, k_pad - K), (0, 0)))
            quads.append(p.astype(MATMUL_DTYPE))
    return quads, ph, pw


def conv_relu_pool(x_chwn, w, b, *, tm=2048):
    """maxpool2x2(relu(conv2d(x, w) + b)) as one fused Pallas GEMM kernel.

    x_chwn : [C_store, H, W, N] channel/spatial-major, batch-minor; only the
             first w.shape[1] channels are read.
    returns [OC_pad, ph, pw, N] bf16 (padded channels are exact zeros and are
             never read downstream).
    """
    out_c, c_in, kh, kw = w.shape
    K = c_in * kh * kw
    k_pad = _round_up(K, K_ALIGN)          # 75 -> 80, 150 -> 160
    oc_pad = _round_up(out_c, OC_ALIGN)    # 6 -> 16, 16 -> 16

    quads, ph, pw = _quadrant_patches(x_chwn, c_in, kh, kw, k_pad)
    N = x_chwn.shape[-1]
    M = ph * pw * N
    TM = _pick_lane_tile(M, tm)
    M_pad = _round_up(M, TM)
    quads = [jnp.pad(q, ((0, 0), (0, M_pad - M))) for q in quads]

    w2 = jnp.pad(w.reshape(out_c, K),
                 ((0, oc_pad - out_c), (0, k_pad - K))).astype(MATMUL_DTYPE)
    b2 = jnp.pad(b, (0, oc_pad - out_c)).reshape(oc_pad, 1).astype(jnp.float32)

    q_spec = pl.BlockSpec((k_pad, TM), lambda m: (0, m))
    w_spec = pl.BlockSpec((oc_pad, k_pad), lambda m: (0, 0))
    b_spec = pl.BlockSpec((oc_pad, 1), lambda m: (0, 0))

    y = pl.pallas_call(
        _conv_pool_kernel,
        out_shape=jax.ShapeDtypeStruct((oc_pad, M_pad), ACT_DTYPE),
        grid_spec=pltpu.PrefetchScalarGridSpec(
            num_scalar_prefetch=0,
            grid=(M_pad // TM,),
            in_specs=[q_spec, q_spec, q_spec, q_spec, w_spec, b_spec],
            out_specs=pl.BlockSpec((oc_pad, TM), lambda m: (0, m)),
        ),
        compiler_params=pltpu.CompilerParams(
            dimension_semantics=("parallel",),
            vmem_limit_bytes=VMEM_LIMIT,
        ),
    )(*quads, w2, b2)

    return y[:, :M].reshape(oc_pad, ph, pw, N)


def fc_stack(x_t, params, masks, *, tn=1024):
    """relu(fc1(x*m1)) -> relu(fc2(.*m2)) -> fc3(.*m3), single Pallas call.

    x_t : [400, N] = torch's x.view(-1, 400) transposed (feature-major,
          batch-minor).  Computing out^T = W @ x^T keeps the batch on the
          128-lane axis, so no activation transpose is needed at this boundary.
    """
    K1, N = x_t.shape
    TN = _pick_lane_tile(N, tn)
    N_pad = _round_up(N, TN)
    xp = jnp.pad(x_t, ((0, FC_K1_PAD - K1), (0, N_pad - N))).astype(MATMUL_DTYPE)

    def eff_w(wm, mask, out_pad, in_pad):
        we = wm * mask[None, :]            # fold 0/1 dropout mask (no 1/p rescale,
        we = jnp.pad(we, ((0, out_pad - we.shape[0]),   # matching the torch code)
                          (0, in_pad - we.shape[1])))
        return we.astype(MATMUL_DTYPE)

    def eff_b(bv, out_pad):
        return jnp.pad(bv, (0, out_pad - bv.shape[0])).reshape(out_pad, 1)

    w1 = eff_w(params["fc1_w"], masks["m1"], FC_H_PAD, FC_K1_PAD)    # [128, 512]
    w2 = eff_w(params["fc2_w"], masks["m2"], FC_H_PAD, FC_H_PAD)     # [128, 128]
    w3 = eff_w(params["fc3_w"], masks["m3"], FC_OUT_PAD, FC_H_PAD)   # [16, 128]
    b1 = eff_b(params["fc1_b"], FC_H_PAD)
    b2 = eff_b(params["fc2_b"], FC_H_PAD)
    b3 = eff_b(params["fc3_b"], FC_OUT_PAD)

    def full(a):
        return pl.BlockSpec(a.shape, lambda i: (0, 0))

    out_t = pl.pallas_call(
        _fc_stack_kernel,
        out_shape=jax.ShapeDtypeStruct((FC_OUT_PAD, N_pad), jnp.float32),
        grid_spec=pltpu.PrefetchScalarGridSpec(
            num_scalar_prefetch=0,
            grid=(N_pad // TN,),
            in_specs=[pl.BlockSpec((FC_K1_PAD, TN), lambda i: (0, i)),
                      full(w1), full(b1), full(w2), full(b2), full(w3), full(b3)],
            out_specs=pl.BlockSpec((FC_OUT_PAD, TN), lambda i: (0, i)),
        ),
        compiler_params=pltpu.CompilerParams(
            dimension_semantics=("parallel",),
            vmem_limit_bytes=VMEM_LIMIT,
        ),
    )(xp, w1, b1, w2, b2, w3, b3)

    return out_t[:10, :N].T                # [N, 10]


# --------------------------- parameter construction -------------------------

def xavier_uniform(key, out_dim, in_dim):
    a = math.sqrt(6.0 / (in_dim + out_dim))
    return jax.random.uniform(key, (out_dim, in_dim), jnp.float32, -a, a)


def conv_params(key, out_c, in_c, k):
    kw_, kb_ = jax.random.split(key)
    bound = 1.0 / math.sqrt(in_c * k * k)          # torch Conv2d default init
    w = jax.random.uniform(kw_, (out_c, in_c, k, k), jnp.float32, -bound, bound)
    b = jax.random.uniform(kb_, (out_c,), jnp.float32, -bound, bound)
    return w, b


def mylinear_params(key, in_dim, out_dim):
    kw_, kb_ = jax.random.split(key)
    w = xavier_uniform(kw_, out_dim, in_dim)
    a = 1.0 / math.sqrt(in_dim)
    b = jax.random.uniform(kb_, (out_dim,), jnp.float32, -a, a)
    return w, b


def init_params(key):
    k = jax.random.split(key, 5)
    p = {}
    p["conv1_w"], p["conv1_b"] = conv_params(k[0], 6, 3, 5)
    p["conv2_w"], p["conv2_b"] = conv_params(k[1], 16, 6, 5)
    p["fc1_w"], p["fc1_b"] = mylinear_params(k[2], 16 * 5 * 5, 120)
    p["fc2_w"], p["fc2_b"] = mylinear_params(k[3], 120, 84)
    p["fc3_w"], p["fc3_b"] = mylinear_params(k[4], 84, 10)
    return p


def init_masks(key):
    # MyLinear: dropout = bernoulli(keep_prob=0.5) applied to the layer input,
    # no 1/keep_prob rescaling — exactly as in the torch code (intentional).
    # Masks are fixed kernel inputs (same as the previously accepted version).
    k1, k2, k3 = jax.random.split(key, 3)
    return {
        "m1": jax.random.bernoulli(k1, 0.5, (16 * 5 * 5,)).astype(jnp.float32),
        "m2": jax.random.bernoulli(k2, 0.5, (120,)).astype(jnp.float32),
        "m3": jax.random.bernoulli(k3, 0.5, (84,)).astype(jnp.float32),
    }


# -------------------------------- forward -----------------------------------

def cnn2_forward(x, params, masks):
    # x: [N, 3, 32, 32] NCHW (LeNet geometry: 32x32 -> 16*5*5 = 400 features)
    n = x.shape[0]
    xc = jnp.transpose(x, (1, 2, 3, 0)).astype(ACT_DTYPE)            # [3,32,32,N]
    y1 = conv_relu_pool(xc, params["conv1_w"], params["conv1_b"])    # [16,14,14,N]
    y2 = conv_relu_pool(y1, params["conv2_w"], params["conv2_b"])    # [16, 5, 5,N]
    x_t = y2.reshape(16 * 5 * 5, n)          # [400, N] == x.view(-1, 400)^T
    return fc_stack(x_t, params, masks)      # [N, 10]


if __name__ == "__main__":
    key = jax.random.PRNGKey(0)
    k_x, k_p, k_m = jax.random.split(key, 3)

    x = jax.random.normal(k_x, (2, 3, 32, 32), jnp.float32)
    params = init_params(k_p)
    masks = init_masks(k_m)

    out = jax.jit(cnn2_forward)(x, params, masks)
    out = jax.block_until_ready(out)
    assert out.shape == (2, 10) and out.dtype == jnp.float32
    print("KERNEL_OK")
</pallas_src>

<mosaic_0001>
module attributes {stable_mosaic.version = 11 : i64} {
  func.func @_conv_pool_kernel(%arg0: i32, %arg1: memref<80x256xbf16, #tpu.memory_space<vmem>>, %arg2: memref<80x256xbf16, #tpu.memory_space<vmem>>, %arg3: memref<80x256xbf16, #tpu.memory_space<vmem>>, %arg4: memref<80x256xbf16, #tpu.memory_space<vmem>>, %arg5: memref<16x80xbf16, #tpu.memory_space<vmem>>, %arg6: memref<16x1xf32, #tpu.memory_space<vmem>>, %arg7: memref<16x256xbf16, #tpu.memory_space<vmem>>) attributes {dimension_semantics = [#tpu.dimension_semantics<parallel>], iteration_bounds = array<i64: 2>, scalar_prefetch = 0 : i64, scratch_operands = 0 : i64, tpu.core_type = #tpu.core_type<tc>, window_params = [{transform_indices = @transform_0, window_bounds = array<i64: 80, 256>}, {transform_indices = @transform_1, window_bounds = array<i64: 80, 256>}, {transform_indices = @transform_2, window_bounds = array<i64: 80, 256>}, {transform_indices = @transform_3, window_bounds = array<i64: 80, 256>}, {pipeline_mode = #tpu.pipeline_mode<synchronous>, transform_indices = @transform_4, window_bounds = array<i64: 16, 80>}, {pipeline_mode = #tpu.pipeline_mode<synchronous>, transform_indices = @transform_5, window_bounds = array<i64: 16, 1>}, {transform_indices = @transform_6, window_bounds = array<i64: 16, 256>}]} {
    %c0 = arith.constant 0 : index
    %c0_0 = arith.constant 0 : index
    %0 = vector.load %arg5[%c0, %c0_0] : memref<16x80xbf16, #tpu.memory_space<vmem>>, vector<16x80xbf16>
    %c0_1 = arith.constant 0 : index
    %c0_2 = arith.constant 0 : index
    %1 = vector.load %arg1[%c0_1, %c0_2] : memref<80x256xbf16, #tpu.memory_space<vmem>>, vector<80x256xbf16>
    %cst = arith.constant dense<0.000000e+00> : vector<16x256xf32>
    %2 = tpu.matmul %0, %1, %cst {dimension_numbers = #tpu.dot_dimension_numbers<[1], [0], [0], [1], [0, 0, 1, 1], [], []>} : vector<16x80xbf16>, vector<80x256xbf16>, vector<16x256xf32> -> vector<16x256xf32>
    %c0_3 = arith.constant 0 : index
    %c0_4 = arith.constant 0 : index
    %3 = vector.load %arg2[%c0_3, %c0_4] : memref<80x256xbf16, #tpu.memory_space<vmem>>, vector<80x256xbf16>
    %cst_5 = arith.constant dense<0.000000e+00> : vector<16x256xf32>
    %4 = tpu.matmul %0, %3, %cst_5 {dimension_numbers = #tpu.dot_dimension_numbers<[1], [0], [0], [1], [0, 0, 1, 1], [], []>} : vector<16x80xbf16>, vector<80x256xbf16>, vector<16x256xf32> -> vector<16x256xf32>
    %5 = arith.maximumf %2, %4 : vector<16x256xf32>
    %c0_6 = arith.constant 0 : index
    %c0_7 = arith.constant 0 : index
    %6 = vector.load %arg3[%c0_6, %c0_7] : memref<80x256xbf16, #tpu.memory_space<vmem>>, vector<80x256xbf16>
    %cst_8 = arith.constant dense<0.000000e+00> : vector<16x256xf32>
    %7 = tpu.matmul %0, %6, %cst_8 {dimension_numbers = #tpu.dot_dimension_numbers<[1], [0], [0], [1], [0, 0, 1, 1], [], []>} : vector<16x80xbf16>, vector<80x256xbf16>, vector<16x256xf32> -> vector<16x256xf32>
    %c0_9 = arith.constant 0 : index
    %c0_10 = arith.constant 0 : index
    %8 = vector.load %arg4[%c0_9, %c0_10] : memref<80x256xbf16, #tpu.memory_space<vmem>>, vector<80x256xbf16>
    %cst_11 = arith.constant dense<0.000000e+00> : vector<16x256xf32>
    %9 = tpu.matmul %0, %8, %cst_11 {dimension_numbers = #tpu.dot_dimension_numbers<[1], [0], [0], [1], [0, 0, 1, 1], [], []>} : vector<16x80xbf16>, vector<80x256xbf16>, vector<16x256xf32> -> vector<16x256xf32>
    %10 = arith.maximumf %7, %9 : vector<16x256xf32>
    %11 = arith.maximumf %5, %10 : vector<16x256xf32>
    %c0_12 = arith.constant 0 : index
    %c0_13 = arith.constant 0 : index
    %12 = vector.load %arg6[%c0_12, %c0_13] : memref<16x1xf32, #tpu.memory_space<vmem>>, vector<16x1xf32>
    %13 = vector.broadcast %12 : vector<16x1xf32> to vector<16x256xf32>
    %14 = arith.addf %11, %13 : vector<16x256xf32>
    %cst_14 = arith.constant 0.000000e+00 : f32
    %15 = vector.broadcast %cst_14 : f32 to vector<16x256xf32>
    %16 = arith.maximumf %14, %15 : vector<16x256xf32>
    %17 = arith.truncf %16 : vector<16x256xf32> to vector<16x256xbf16>
    %c0_15 = arith.constant 0 : index
    %c0_16 = arith.constant 0 : index
    %18 = vector.load %arg7[%c0_15, %c0_16] : memref<16x256xbf16, #tpu.memory_space<vmem>>, vector<16x256xbf16>
    tpu.vector_store %arg7[%c0_15, %c0_16], %17 {strides = array<i32>} : memref<16x256xbf16, #tpu.memory_space<vmem>>, vector<16x256xbf16>,
    return
  }
  func.func @transform_0(%arg0: i32) -> (i32, i32) {
    %c0_i32 = arith.constant 0 : i32
    %c0_i32_0 = arith.constant 0 : i32
    return %c0_i32, %arg0 : i32, i32
  }
  func.func @transform_1(%arg0: i32) -> (i32, i32) {
    %c0_i32 = arith.constant 0 : i32
    %c0_i32_0 = arith.constant 0 : i32
    return %c0_i32, %arg0 : i32, i32
  }
  func.func @transform_2(%arg0: i32) -> (i32, i32) {
    %c0_i32 = arith.constant 0 : i32
    %c0_i32_0 = arith.constant 0 : i32
    return %c0_i32, %arg0 : i32, i32
  }
  func.func @transform_3(%arg0: i32) -> (i32, i32) {
    %c0_i32 = arith.constant 0 : i32
    %c0_i32_0 = arith.constant 0 : i32
    return %c0_i32, %arg0 : i32, i32
  }
  func.func @transform_4(%arg0: i32) -> (i32, i32) {
    %c0_i32 = arith.constant 0 : i32
    %c0_i32_0 = arith.constant 0 : i32
    %c0_i32_1 = arith.constant 0 : i32
    return %c0_i32, %c0_i32_0 : i32, i32
  }
  func.func @transform_5(%arg0: i32) -> (i32, i32) {
    %c0_i32 = arith.constant 0 : i32
    %c0_i32_0 = arith.constant 0 : i32
    %c0_i32_1 = arith.constant 0 : i32
    return %c0_i32, %c0_i32_0 : i32, i32
  }
  func.func @transform_6(%arg0: i32) -> (i32, i32) {
    %c0_i32 = arith.constant 0 : i32
    %c0_i32_0 = arith.constant 0 : i32
    return %c0_i32, %arg0 : i32, i32
  }
}

module attributes {stable_mosaic.version = 11 : i64} {
  func.func @_conv_pool_kernel(%arg0: i32, %arg1: memref<160x128xbf16, #tpu.memory_space<vmem>>, %arg2: memref<160x128xbf16, #tpu.memory_space<vmem>>, %arg3: memref<160x128xbf16, #tpu.memory_space<vmem>>, %arg4: memref<160x128xbf16, #tpu.memory_space<vmem>>, %arg5: memref<16x160xbf16, #tpu.memory_space<vmem>>, %arg6: memref<16x1xf32, #tpu.memory_space<vmem>>, %arg7: memref<16x128xbf16, #tpu.memory_space<vmem>>) attributes {dimension_semantics = [#tpu.dimension_semantics<parallel>], iteration_bounds = array<i64: 1>, scalar_prefetch = 0 : i64, scratch_operands = 0 : i64, tpu.core_type = #tpu.core_type<tc>, window_params = [{transform_indices = @transform_0, window_bounds = array<i64: 160, 128>}, {transform_indices = @transform_1, window_bounds = array<i64: 160, 128>}, {transform_indices = @transform_2, window_bounds = array<i64: 160, 128>}, {transform_indices = @transform_3, window_bounds = array<i64: 160, 128>}, {pipeline_mode = #tpu.pipeline_mode<synchronous>, transform_indices = @transform_4, window_bounds = array<i64: 16, 160>}, {pipeline_mode = #tpu.pipeline_mode<synchronous>, transform_indices = @transform_5, window_bounds = array<i64: 16, 1>}, {transform_indices = @transform_6, window_bounds = array<i64: 16, 128>}]} {
    %c0 = arith.constant 0 : index
    %c0_0 = arith.constant 0 : index
    %0 = vector.load %arg5[%c0, %c0_0] : memref<16x160xbf16, #tpu.memory_space<vmem>>, vector<16x160xbf16>
    %c0_1 = arith.constant 0 : index
    %c0_2 = arith.constant 0 : index
    %1 = vector.load %arg1[%c0_1, %c0_2] : memref<160x128xbf16, #tpu.memory_space<vmem>>, vector<160x128xbf16>
    %cst = arith.constant dense<0.000000e+00> : vector<16x128xf32>
    %2 = tpu.matmul %0, %1, %cst {dimension_numbers = #tpu.dot_dimension_numbers<[1], [0], [0], [1], [0, 0, 1, 1], [], []>} : vector<16x160xbf16>, vector<160x128xbf16>, vector<16x128xf32> -> vector<16x128xf32>
    %c0_3 = arith.constant 0 : index
    %c0_4 = arith.constant 0 : index
    %3 = vector.load %arg2[%c0_3, %c0_4] : memref<160x128xbf16, #tpu.memory_space<vmem>>, vector<160x128xbf16>
    %cst_5 = arith.constant dense<0.000000e+00> : vector<16x128xf32>
    %4 = tpu.matmul %0, %3, %cst_5 {dimension_numbers = #tpu.dot_dimension_numbers<[1], [0], [0], [1], [0, 0, 1, 1], [], []>} : vector<16x160xbf16>, vector<160x128xbf16>, vector<16x128xf32> -> vector<16x128xf32>
    %5 = arith.maximumf %2, %4 : vector<16x128xf32>
    %c0_6 = arith.constant 0 : index
    %c0_7 = arith.constant 0 : index
    %6 = vector.load %arg3[%c0_6, %c0_7] : memref<160x128xbf16, #tpu.memory_space<vmem>>, vector<160x128xbf16>
    %cst_8 = arith.constant dense<0.000000e+00> : vector<16x128xf32>
    %7 = tpu.matmul %0, %6, %cst_8 {dimension_numbers = #tpu.dot_dimension_numbers<[1], [0], [0], [1], [0, 0, 1, 1], [], []>} : vector<16x160xbf16>, vector<160x128xbf16>, vector<16x128xf32> -> vector<16x128xf32>
    %c0_9 = arith.constant 0 : index
    %c0_10 = arith.constant 0 : index
    %8 = vector.load %arg4[%c0_9, %c0_10] : memref<160x128xbf16, #tpu.memory_space<vmem>>, vector<160x128xbf16>
    %cst_11 = arith.constant dense<0.000000e+00> : vector<16x128xf32>
    %9 = tpu.matmul %0, %8, %cst_11 {dimension_numbers = #tpu.dot_dimension_numbers<[1], [0], [0], [1], [0, 0, 1, 1], [], []>} : vector<16x160xbf16>, vector<160x128xbf16>, vector<16x128xf32> -> vector<16x128xf32>
    %10 = arith.maximumf %7, %9 : vector<16x128xf32>
    %11 = arith.maximumf %5, %10 : vector<16x128xf32>
    %c0_12 = arith.constant 0 : index
    %c0_13 = arith.constant 0 : index
    %12 = vector.load %arg6[%c0_12, %c0_13] : memref<16x1xf32, #tpu.memory_space<vmem>>, vector<16x1xf32>
    %13 = vector.broadcast %12 : vector<16x1xf32> to vector<16x128xf32>
    %14 = arith.addf %11, %13 : vector<16x128xf32>
    %cst_14 = arith.constant 0.000000e+00 : f32
    %15 = vector.broadcast %cst_14 : f32 to vector<16x128xf32>
    %16 = arith.maximumf %14, %15 : vector<16x128xf32>
    %17 = arith.truncf %16 : vector<16x128xf32> to vector<16x128xbf16>
    %c0_15 = arith.constant 0 : index
    %c0_16 = arith.constant 0 : index
    %18 = vector.load %arg7[%c0_15, %c0_16] : memref<16x128xbf16, #tpu.memory_space<vmem>>, vector<16x128xbf16>
    tpu.vector_store %arg7[%c0_15, %c0_16], %17 {strides = array<i32>} : memref<16x128xbf16, #tpu.memory_space<vmem>>, vector<16x128xbf16>,
    return
  }
  func.func @transform_0(%arg0: i32) -> (i32, i32) {
    %c0_i32 = arith.constant 0 : i32
    %c0_i32_0 = arith.constant 0 : i32
    return %c0_i32, %arg0 : i32, i32
  }
  func.func @transform_1(%arg0: i32) -> (i32, i32) {
    %c0_i32 = arith.constant 0 : i32
    %c0_i32_0 = arith.constant 0 : i32
    return %c0_i32, %arg0 : i32, i32
  }
  func.func @transform_2(%arg0: i32) -> (i32, i32) {
    %c0_i32 = arith.constant 0 : i32
    %c0_i32_0 = arith.constant 0 : i32
    return %c0_i32, %arg0 : i32, i32
  }
  func.func @transform_3(%arg0: i32) -> (i32, i32) {
    %c0_i32 = arith.constant 0 : i32
    %c0_i32_0 = arith.constant 0 : i32
    return %c0_i32, %arg0 : i32, i32
  }
  func.func @transform_4(%arg0: i32) -> (i32, i32) {
    %c0_i32 = arith.constant 0 : i32
    %c0_i32_0 = arith.constant 0 : i32
    %c0_i32_1 = arith.constant 0 : i32
    return %c0_i32, %c0_i32_0 : i32, i32
  }
  func.func @transform_5(%arg0: i32) -> (i32, i32) {
    %c0_i32 = arith.constant 0 : i32
    %c0_i32_0 = arith.constant 0 : i32
    %c0_i32_1 = arith.constant 0 : i32
    return %c0_i32, %c0_i32_0 : i32, i32
  }
  func.func @transform_6(%arg0: i32) -> (i32, i32) {
    %c0_i32 = arith.constant 0 : i32
    %c0_i32_0 = arith.constant 0 : i32
    return %c0_i32, %arg0 : i32, i32
  }
}

module attributes {stable_mosaic.version = 11 : i64} {
  func.func @_fc_stack_kernel(%arg0: i32, %arg1: memref<512x128xbf16, #tpu.memory_space<vmem>>, %arg2: memref<128x512xbf16, #tpu.memory_space<vmem>>, %arg3: memref<128x1xf32, #tpu.memory_space<vmem>>, %arg4: memref<128x128xbf16, #tpu.memory_space<vmem>>, %arg5: memref<128x1xf32, #tpu.memory_space<vmem>>, %arg6: memref<16x128xbf16, #tpu.memory_space<vmem>>, %arg7: memref<16x1xf32, #tpu.memory_space<vmem>>, %arg8: memref<16x128xf32, #tpu.memory_space<vmem>>) attributes {dimension_semantics = [#tpu.dimension_semantics<parallel>], iteration_bounds = array<i64: 1>, scalar_prefetch = 0 : i64, scratch_operands = 0 : i64, tpu.core_type = #tpu.core_type<tc>, window_params = [{transform_indices = @transform_0, window_bounds = array<i64: 512, 128>}, {pipeline_mode = #tpu.pipeline_mode<synchronous>, transform_indices = @transform_1, window_bounds = array<i64: 128, 512>}, {pipeline_mode = #tpu.pipeline_mode<synchronous>, transform_indices = @transform_2, window_bounds = array<i64: 128, 1>}, {pipeline_mode = #tpu.pipeline_mode<synchronous>, transform_indices = @transform_3, window_bounds = array<i64: 128, 128>}, {pipeline_mode = #tpu.pipeline_mode<synchronous>, transform_indices = @transform_4, window_bounds = array<i64: 128, 1>}, {pipeline_mode = #tpu.pipeline_mode<synchronous>, transform_indices = @transform_5, window_bounds = array<i64: 16, 128>}, {pipeline_mode = #tpu.pipeline_mode<synchronous>, transform_indices = @transform_6, window_bounds = array<i64: 16, 1>}, {transform_indices = @transform_7, window_bounds = array<i64: 16, 128>}]} {
    %c0 = arith.constant 0 : index
    %c0_0 = arith.constant 0 : index
    %0 = vector.load %arg2[%c0, %c0_0] : memref<128x512xbf16, #tpu.memory_space<vmem>>, vector<128x512xbf16>
    %c0_1 = arith.constant 0 : index
    %c0_2 = arith.constant 0 : index
    %1 = vector.load %arg1[%c0_1, %c0_2] : memref<512x128xbf16, #tpu.memory_space<vmem>>, vector<512x128xbf16>
    %cst = arith.constant dense<0.000000e+00> : vector<128x128xf32>
    %2 = tpu.matmul %0, %1, %cst {dimension_numbers = #tpu.dot_dimension_numbers<[1], [0], [0], [1], [0, 0, 1, 1], [], []>} : vector<128x512xbf16>, vector<512x128xbf16>, vector<128x128xf32> -> vector<128x128xf32>
    %c0_3 = arith.constant 0 : index
    %c0_4 = arith.constant 0 : index
    %3 = vector.load %arg3[%c0_3, %c0_4] : memref<128x1xf32, #tpu.memory_space<vmem>>, vector<128x1xf32>
    %4 = vector.broadcast %3 : vector<128x1xf32> to vector<128x128xf32>
    %5 = arith.addf %2, %4 : vector<128x128xf32>
    %cst_5 = arith.constant 0.000000e+00 : f32
    %6 = vector.broadcast %cst_5 : f32 to vector<128x128xf32>
    %7 = arith.maximumf %5, %6 : vector<128x128xf32>
    %c0_6 = arith.constant 0 : index
    %c0_7 = arith.constant 0 : index
    %8 = vector.load %arg4[%c0_6, %c0_7] : memref<128x128xbf16, #tpu.memory_space<vmem>>, vector<128x128xbf16>
    %9 = arith.truncf %7 : vector<128x128xf32> to vector<128x128xbf16>
    %cst_8 = arith.constant dense<0.000000e+00> : vector<128x128xf32>
    %10 = tpu.matmul %8, %9, %cst_8 {dimension_numbers = #tpu.dot_dimension_numbers<[1], [0], [0], [1], [0, 0, 1, 1], [], []>} : vector<128x128xbf16>, vector<128x128xbf16>, vector<128x128xf32> -> vector<128x128xf32>
    %c0_9 = arith.constant 0 : index
    %c0_10 = arith.constant 0 : index
    %11 = vector.load %arg5[%c0_9, %c0_10] : memref<128x1xf32, #tpu.memory_space<vmem>>, vector<128x1xf32>
    %12 = vector.broadcast %11 : vector<128x1xf32> to vector<128x128xf32>
    %13 = arith.addf %10, %12 : vector<128x128xf32>
    %cst_11 = arith.constant 0.000000e+00 : f32
    %14 = vector.broadcast %cst_11 : f32 to vector<128x128xf32>
    %15 = arith.maximumf %13, %14 : vector<128x128xf32>
    %c0_12 = arith.constant 0 : index
    %c0_13 = arith.constant 0 : index
    %16 = vector.load %arg6[%c0_12, %c0_13] : memref<16x128xbf16, #tpu.memory_space<vmem>>, vector<16x128xbf16>
    %17 = arith.truncf %15 : vector<128x128xf32> to vector<128x128xbf16>
    %cst_14 = arith.constant dense<0.000000e+00> : vector<16x128xf32>
    %18 = tpu.matmul %16, %17, %cst_14 {dimension_numbers = #tpu.dot_dimension_numbers<[1], [0], [0], [1], [0, 0, 1, 1], [], []>} : vector<16x128xbf16>, vector<128x128xbf16>, vector<16x128xf32> -> vector<16x128xf32>
    %c0_15 = arith.constant 0 : index
    %c0_16 = arith.constant 0 : index
    %19 = vector.load %arg7[%c0_15, %c0_16] : memref<16x1xf32, #tpu.memory_space<vmem>>, vector<16x1xf32>
    %20 = vector.broadcast %19 : vector<16x1xf32> to vector<16x128xf32>
    %21 = arith.addf %18, %20 : vector<16x128xf32>
    %c0_17 = arith.constant 0 : index
    %c0_18 = arith.constant 0 : index
    %22 = vector.load %arg8[%c0_17, %c0_18] : memref<16x128xf32, #tpu.memory_space<vmem>>, vector<16x128xf32>
    tpu.vector_store %arg8[%c0_17, %c0_18], %21 {strides = array<i32>} : memref<16x128xf32, #tpu.memory_space<vmem>>, vector<16x128xf32>,
    return
  }
  func.func @transform_0(%arg0: i32) -> (i32, i32) {
    %c0_i32 = arith.constant 0 : i32
    %c0_i32_0 = arith.constant 0 : i32
    return %c0_i32, %arg0 : i32, i32
  }
  func.func @transform_1(%arg0: i32) -> (i32, i32) {
    %c0_i32 = arith.constant 0 : i32
    %c0_i32_0 = arith.constant 0 : i32
    %c0_i32_1 = arith.constant 0 : i32
    return %c0_i32, %c0_i32_0 : i32, i32
  }
  func.func @transform_2(%arg0: i32) -> (i32, i32) {
    %c0_i32 = arith.constant 0 : i32
    %c0_i32_0 = arith.constant 0 : i32
    %c0_i32_1 = arith.constant 0 : i32
    return %c0_i32, %c0_i32_0 : i32, i32
  }
  func.func @transform_3(%arg0: i32) -> (i32, i32) {
    %c0_i32 = arith.constant 0 : i32
    %c0_i32_0 = arith.constant 0 : i32
    %c0_i32_1 = arith.constant 0 : i32
    return %c0_i32, %c0_i32_0 : i32, i32
  }
  func.func @transform_4(%arg0: i32) -> (i32, i32) {
    %c0_i32 = arith.constant 0 : i32
    %c0_i32_0 = arith.constant 0 : i32
    %c0_i32_1 = arith.constant 0 : i32
    return %c0_i32, %c0_i32_0 : i32, i32
  }
  func.func @transform_5(%arg0: i32) -> (i32, i32) {
    %c0_i32 = arith.constant 0 : i32
    %c0_i32_0 = arith.constant 0 : i32
    %c0_i32_1 = arith.constant 0 : i32
    return %c0_i32, %c0_i32_0 : i32, i32
  }
  func.func @transform_6(%arg0: i32) -> (i32, i32) {
    %c0_i32 = arith.constant 0 : i32
    %c0_i32_0 = arith.constant 0 : i32
    %c0_i32_1 = arith.constant 0 : i32
    return %c0_i32, %c0_i32_0 : i32, i32
  }
  func.func @transform_7(%arg0: i32) -> (i32, i32) {
    %c0_i32 = arith.constant 0 : i32
    %c0_i32_0 = arith.constant 0 : i32
    return %c0_i32, %arg0 : i32, i32
  }
}

</mosaic_0001>

<bundles_post_ra>
// kernel: cnn2_forward.3
= control target key start
LH: loop header
LB: loop body
LE: loop exit
PB: predicated region body
PF: predicated region fallthrough
CT: control target
= control target key end

     0   :  { %s1446_s21 = smov 0   ;;  %s1448_s22 = smov 0   ;;  %s1609_s0 = inlined_call_operand.vmem [shape: bf16[80,512], index: 0, kind: input, shape index: {}]   ;;  %s1610_s1 = inlined_call_operand.vmem [shape: bf16[80,512], index: 1, kind: input, shape index: {}]   ;;  %s1611_s2 = inlined_call_operand.vmem [shape: bf16[80,512], index: 2, kind: input, shape index: {}]   ;;  %s1612_s3 = inlined_call_operand.vmem [shape: bf16[80,512], index: 3, kind: input, shape index: {}]   ;;  %s1613_s4 = inlined_call_operand.vmem [shape: bf16[16,80], index: 4, kind: input, shape index: {}]   ;;  %s1614_s5 = inlined_call_operand.vmem [shape: f32[16,1], index: 5, kind: input, shape index: {}]   ;;  %s1615_s6 = inlined_call_operand.vmem [shape: bf16[16,512], index: 6, kind: output, shape index: {}]  }
   0x1   :  { %s1450_s23 = smov 0  }
   0x2 LB: > { %s1221_s24 = sadd.s32 4294967295, %s1408_s23   ;;  %s1463_s25 = sadd.s32 1, %s1408_s23   ;;  %s1408_s23 = sphi %s1450_s23, %s1620_s23   ;;  %s1404_s22 = sphi %s1448_s22, %s1619_s22   ;;  %s1400_s21 = sphi %s1446_s21, %s1618_s21  }
   0x3   : > { %s20_s26 = ssub.s32 %s1408_s23, %s1463_s25  ;;  %s23_s27 = sadd.s32 1, %s1404_s22 }
   0x4   : > { %p21_p0 = scmp.eq.s32.totalorder %s20_s26, 0  ;;  %p30_p1 = scmp.ne.s32.totalorder %s1404_s22, %s1400_s21 }
   0x5   : > { %p31_p2 = scmp.eq.s32.totalorder %s1408_s23, 0  ;;  %p180_p3 = scmp.eq.s32.totalorder %s1221_s24, 1 }
   0x6   : > { %s1474_s28 = scalar_select %p21_p0, %s1404_s22, %s23_s27  }
   0x7   : > { %p1476_p4 = por %p31_p2, %p30_p1  ;;  %p1480_p5 = por %p180_p3, %p30_p1 }
   0x8   : > { %p1224_p6 = scmp.ge.s32.totalorder %s1408_s23, 2 }
   0xa   : > { %208 = sbr.rel (%p1224_p6) target bundleno = 53 (0x35), region = 24 }
  0x11   : > { %211 = sbr.rel (!%p1476_p4) target bundleno = 26 (0x1a), region = 28  ;;  %s213_s7 = sand.u32 (%p1476_p4), 1, %s1404_s22  }
  0x12   : > { %s1287_s8 = sshll.u32 (%p1476_p4), %s1408_s23, 3  ;;  %s1294_s9 = smul.u32 (%p1476_p4), 80, %s213_s7 }
  0x13   : > { %s218_s12 = scalar_lea.vmem (%p1476_p4), %s1609_s0, %s1287_s8 }
  0x14   : > { %v264_v0 = vld [vmem:[%s218_s12] sm:$0xff] (%p1476_p4)  ;;  %v266_v1 = vld [vmem:[%s218_s12 + $0x10] sm:$0xff] (%p1476_p4)  ;;  %s215_s13 = scalar_lea.vmem (%p1476_p4), [#allocation2], %s1294_s9 }
  0x15   : > { %v268_v2 = vld [vmem:[%s218_s12 + $0x20] sm:$0xff] (%p1476_p4)  ;;  %v270_v3 = vld [vmem:[%s218_s12 + $0x30] sm:$0xff] (%p1476_p4)  ;;  %265 = vst [vmem:[%s215_s13] sm:$0xff] (%p1476_p4), %v264_v0  ;;  %267 = vst [vmem:[%s215_s13 + $0x8] sm:$0xff] (%p1476_p4), %v266_v1 }
  0x16   : > { %v272_v4 = vld [vmem:[%s218_s12 + $0x40] sm:$0xff] (%p1476_p4)  ;;  %v274_v5 = vld [vmem:[%s218_s12 + $0x50] sm:$0xff] (%p1476_p4)  ;;  %269 = vst [vmem:[%s215_s13 + $0x10] sm:$0xff] (%p1476_p4), %v268_v2  ;;  %271 = vst [vmem:[%s215_s13 + $0x18] sm:$0xff] (%p1476_p4), %v270_v3 }
  0x17   : > { %273 = vst [vmem:[%s215_s13 + $0x20] sm:$0xff] (%p1476_p4), %v272_v4  ;;  %275 = vst [vmem:[%s215_s13 + $0x28] sm:$0xff] (%p1476_p4), %v274_v5  ;;  %v276_v6 = vld [vmem:[%s218_s12 + $0x60] sm:$0xff] (%p1476_p4)  ;;  %v278_v7 = vld [vmem:[%s218_s12 + $0x70] sm:$0xff] (%p1476_p4) }
  0x18   : > { %v280_v8 = vld [vmem:[%s218_s12 + $0x80] sm:$0xff]  ;;  %277 = vst [vmem:[%s215_s13 + $0x30] sm:$0xff] %v276_v6  ;;  %279 = vst [vmem:[%s215_s13 + $0x38] sm:$0xff] %v278_v7  ;;  %v282_v9 = vld [vmem:[%s218_s12 + $0x90] sm:$0xff] }
  0x19   : > { %281 = vst [vmem:[%s215_s13 + $0x40] sm:$0xff] %v280_v8  ;;  %283 = vst [vmem:[%s215_s13 + $0x48] sm:$0xff] %v282_v9 }
  0x1a PF: > { %289 = sbr.rel (!%p1476_p4) target bundleno = 35 (0x23), region = 66  ;;  %s291_s14 = sand.u32 (%p1476_p4), 1, %s1404_s22  }
  0x1b   : > { %s1288_s15 = sshll.u32 (%p1476_p4), %s1408_s23, 3  ;;  %s1295_s16 = smul.u32 (%p1476_p4), 80, %s291_s14 }
  0x1c   : > { %s296_s19 = scalar_lea.vmem (%p1476_p4), %s1610_s1, %s1288_s15 }
  0x1d   : > { %v342_v10 = vld [vmem:[%s296_s19] sm:$0xff] (%p1476_p4)  ;;  %v344_v11 = vld [vmem:[%s296_s19 + $0x10] sm:$0xff] (%p1476_p4)  ;;  %s293_s20 = scalar_lea.vmem (%p1476_p4), [#allocation3], %s1295_s16 }
  0x1e   : > { %v346_v12 = vld [vmem:[%s296_s19 + $0x20] sm:$0xff] (%p1476_p4)  ;;  %v348_v13 = vld [vmem:[%s296_s19 + $0x30] sm:$0xff] (%p1476_p4)  ;;  %343 = vst [vmem:[%s293_s20] sm:$0xff] (%p1476_p4), %v342_v10  ;;  %345 = vst [vmem:[%s293_s20 + $0x8] sm:$0xff] (%p1476_p4), %v344_v11 }
  0x1f   : > { %v350_v14 = vld [vmem:[%s296_s19 + $0x40] sm:$0xff] (%p1476_p4)  ;;  %v352_v15 = vld [vmem:[%s296_s19 + $0x50] sm:$0xff] (%p1476_p4)  ;;  %347 = vst [vmem:[%s293_s20 + $0x10] sm:$0xff] (%p1476_p4), %v346_v12  ;;  %349 = vst [vmem:[%s293_s20 + $0x18] sm:$0xff] (%p1476_p4), %v348_v13 }
  0x20   : > { %351 = vst [vmem:[%s293_s20 + $0x20] sm:$0xff] (%p1476_p4), %v350_v14  ;;  %353 = vst [vmem:[%s293_s20 + $0x28] sm:$0xff] (%p1476_p4), %v352_v15  ;;  %v354_v16 = vld [vmem:[%s296_s19 + $0x60] sm:$0xff] (%p1476_p4)  ;;  %v356_v17 = vld [vmem:[%s296_s19 + $0x70] sm:$0xff] (%p1476_p4) }
  0x21   : > { %v358_v18 = vld [vmem:[%s296_s19 + $0x80] sm:$0xff]  ;;  %355 = vst [vmem:[%s293_s20 + $0x30] sm:$0xff] %v354_v16  ;;  %357 = vst [vmem:[%s293_s20 + $0x38] sm:$0xff] %v356_v17  ;;  %v360_v19 = vld [vmem:[%s296_s19 + $0x90] sm:$0xff] }
  0x22   : > { %359 = vst [vmem:[%s293_s20 + $0x40] sm:$0xff] %v358_v18  ;;  %361 = vst [vmem:[%s293_s20 + $0x48] sm:$0xff] %v360_v19 }
  0x23 PF: > { %367 = sbr.rel (!%p1476_p4) target bundleno = 44 (0x2c), region = 104  ;;  %s369_s26 = sand.u32 (%p1476_p4), 1, %s1404_s22  }
  0x24   : > { %s1289_s27 = sshll.u32 (%p1476_p4), %s1408_s23, 3  ;;  %s1296_s7 = smul.u32 (%p1476_p4), 80, %s369_s26 }
  0x25   : > { %s374_s10 = scalar_lea.vmem (%p1476_p4), %s1611_s2, %s1289_s27 }
  0x26   : > { %v420_v20 = vld [vmem:[%s374_s10] sm:$0xff] (%p1476_p4)  ;;  %v422_v21 = vld [vmem:[%s374_s10 + $0x10] sm:$0xff] (%p1476_p4)  ;;  %s371_s11 = scalar_lea.vmem (%p1476_p4), [#allocation4], %s1296_s7 }
  0x27   : > { %v424_v22 = vld [vmem:[%s374_s10 + $0x20] sm:$0xff] (%p1476_p4)  ;;  %v426_v23 = vld [vmem:[%s374_s10 + $0x30] sm:$0xff] (%p1476_p4)  ;;  %421 = vst [vmem:[%s371_s11] sm:$0xff] (%p1476_p4), %v420_v20  ;;  %423 = vst [vmem:[%s371_s11 + $0x8] sm:$0xff] (%p1476_p4), %v422_v21 }
  0x28   : > { %v428_v24 = vld [vmem:[%s374_s10 + $0x40] sm:$0xff] (%p1476_p4)  ;;  %v430_v25 = vld [vmem:[%s374_s10 + $0x50] sm:$0xff] (%p1476_p4)  ;;  %425 = vst [vmem:[%s371_s11 + $0x10] sm:$0xff] (%p1476_p4), %v424_v22  ;;  %427 = vst [vmem:[%s371_s11 + $0x18] sm:$0xff] (%p1476_p4), %v426_v23 }
  0x29   : > { %429 = vst [vmem:[%s371_s11 + $0x20] sm:$0xff] (%p1476_p4), %v428_v24  ;;  %431 = vst [vmem:[%s371_s11 + $0x28] sm:$0xff] (%p1476_p4), %v430_v25  ;;  %v432_v26 = vld [vmem:[%s374_s10 + $0x60] sm:$0xff] (%p1476_p4)  ;;  %v434_v27 = vld [vmem:[%s374_s10 + $0x70] sm:$0xff] (%p1476_p4) }
  0x2a   : > { %v436_v28 = vld [vmem:[%s374_s10 + $0x80] sm:$0xff]  ;;  %433 = vst [vmem:[%s371_s11 + $0x30] sm:$0xff] %v432_v26  ;;  %435 = vst [vmem:[%s371_s11 + $0x38] sm:$0xff] %v434_v27  ;;  %v438_v29 = vld [vmem:[%s374_s10 + $0x90] sm:$0xff] }
  0x2b   : > { %437 = vst [vmem:[%s371_s11 + $0x40] sm:$0xff] %v436_v28  ;;  %439 = vst [vmem:[%s371_s11 + $0x48] sm:$0xff] %v438_v29 }
  0x2c PF: > { %445 = sbr.rel (!%p1476_p4) target bundleno = 53 (0x35), region = 142  ;;  %s447_s12 = sand.u32 (%p1476_p4), 1, %s1404_s22  }
  0x2d   : > { %s1290_s13 = sshll.u32 (%p1476_p4), %s1408_s23, 3  ;;  %s1297_s14 = smul.u32 (%p1476_p4), 80, %s447_s12 }
  0x2e   : > { %s452_s17 = scalar_lea.vmem (%p1476_p4), %s1612_s3, %s1290_s13 }
  0x2f   : > { %v498_v30 = vld [vmem:[%s452_s17] sm:$0xff] (%p1476_p4)  ;;  %v500_v31 = vld [vmem:[%s452_s17 + $0x10] sm:$0xff] (%p1476_p4)  ;;  %s449_s18 = scalar_lea.vmem (%p1476_p4), [#allocation5], %s1297_s14 }
  0x30   : > { %v502_v32 = vld [vmem:[%s452_s17 + $0x20] sm:$0xff] (%p1476_p4)  ;;  %v504_v33 = vld [vmem:[%s452_s17 + $0x30] sm:$0xff] (%p1476_p4)  ;;  %499 = vst [vmem:[%s449_s18] sm:$0xff] (%p1476_p4), %v498_v30  ;;  %501 = vst [vmem:[%s449_s18 + $0x8] sm:$0xff] (%p1476_p4), %v500_v31 }
  0x31   : > { %v506_v34 = vld [vmem:[%s452_s17 + $0x40] sm:$0xff] (%p1476_p4)  ;;  %v508_v35 = vld [vmem:[%s452_s17 + $0x50] sm:$0xff] (%p1476_p4)  ;;  %503 = vst [vmem:[%s449_s18 + $0x10] sm:$0xff] (%p1476_p4), %v502_v32  ;;  %505 = vst [vmem:[%s449_s18 + $0x18] sm:$0xff] (%p1476_p4), %v504_v33 }
  0x32   : > { %507 = vst [vmem:[%s449_s18 + $0x20] sm:$0xff] (%p1476_p4), %v506_v34  ;;  %509 = vst [vmem:[%s449_s18 + $0x28] sm:$0xff] (%p1476_p4), %v508_v35  ;;  %v510_v36 = vld [vmem:[%s452_s17 + $0x60] sm:$0xff] (%p1476_p4)  ;;  %v512_v37 = vld [vmem:[%s452_s17 + $0x70] sm:$0xff] (%p1476_p4) }
  0x33   : > { %v514_v38 = vld [vmem:[%s452_s17 + $0x80] sm:$0xff]  ;;  %511 = vst [vmem:[%s449_s18 + $0x30] sm:$0xff] %v510_v36  ;;  %513 = vst [vmem:[%s449_s18 + $0x38] sm:$0xff] %v512_v37  ;;  %v516_v39 = vld [vmem:[%s452_s17 + $0x90] sm:$0xff] }
  0x34   : > { %515 = vst [vmem:[%s449_s18 + $0x40] sm:$0xff] %v514_v38  ;;  %517 = vst [vmem:[%s449_s18 + $0x48] sm:$0xff] %v516_v39 }
  0x35 PF: > { %p1233_p7 = scmp.ge.s32.totalorder %s1408_s23, 1  ;;  %p522_p8 = scmp.lt.s32.totalorder %s1408_s23, 3 }
  0x37   : > { %p523_p9 = pnand %p1233_p7, %p522_p8 }
  0x38   : > { %s529_s29 = sand.u32 (!%p523_p9), 1, %s1400_s21   ;;  %v1410_v40 = vmov (!%p523_p9), 0   ;;  %v1031_v41 = vld [vmem:[%s1614_s5] sm:$0xff] (!%p523_p9)  ;;  %v1032_v42 = vld [vmem:[%s1614_s5 + $0x8] sm:$0xff] (!%p523_p9)  ;;  %vm663_vm0 = vcmask (!%p523_p9), 654336  }
  0x39   : > { %526 = sbr.rel (%p523_p9) target bundleno = 337 (0x151), region = 180  ;;  %699 = vmatprep.mubr.bf16.mxu0 (!%p523_p9), %v1410_v40  ;;  %802 = vmatprep.mubr.bf16.mxu1 (!%p523_p9), %v1410_v40  ;;  %v1355_v1 = vld [vmem:[%s1613_s4] sm:$0xff] (!%p523_p9)   ;;  %s1234_s14 = sshll.u32 (!%p523_p9), %s529_s29, 4 }
  0x3a   : > { %s1518_s19 = smul.u32 (!%p523_p9), 80, %s529_s29  ;;  %1324 = vset.pattern.permute.xlu0 (!%p523_p9), %v1410_v40  ;;  %s589_s15 = scalar_lea.vmem (!%p523_p9), [#allocation6], %s1234_s14 }
  0x3b   : > { %1035 = vperm.xlu0 (!%p523_p9), %1324, %v1031_v41  }
  0x3c   : > { %s1530_s8 = scalar_lea.vmem (!%p523_p9), [#allocation2], %s1518_s19  ;;  %s1534_s9 = scalar_lea.vmem (!%p523_p9), [#allocation3], %s1518_s19 }
  0x3d   : > { %v1325_v43 = vld [vmem:[%s1530_s8 + $0x4] ss:$8 sps:$4 sm:$0xff] (!%p523_p9)   ;;  %v1329_v45 = vld [vmem:[%s1530_s8] ss:$8 sps:$4 sm:$0xff] (!%p523_p9)   ;;  %v1331_v47 = vld [vmem:[%s1530_s8 + $0x14] ss:$8 sps:$4 sm:$0xff] (!%p523_p9)  }
  0x3e   : > { %v1327_v44 = vld [vmem:[%s1534_s9 + $0x4] ss:$8 sps:$4 sm:$0xff] (!%p523_p9)   ;;  %667 = vmatprep.subr.bf16.mxu0 (!%p523_p9), %v1325_v43  ;;  %v1330_v46 = vld [vmem:[%s1534_s9] ss:$8 sps:$4 sm:$0xff] (!%p523_p9)   ;;  %v1333_v48 = vld [vmem:[%s1534_s9 + $0x14] ss:$8 sps:$4 sm:$0xff] (!%p523_p9)  }
  0x3f   : > { %770 = vmatprep.subr.bf16.mxu1 (!%p523_p9), %v1327_v44  ;;  %1040 = vperm.xlu0 (!%p523_p9), %1324, %v1032_v42   ;;  %v1335_v49 = vld [vmem:[%s1530_s8 + $0x10] ss:$8 sps:$4 sm:$0xff] (!%p523_p9)   ;;  %v1337_v51 = vld [vmem:[%s1530_s8 + $0x24] ss:$8 sps:$4 sm:$0xff] (!%p523_p9)   ;;  %v1341_v53 = vld [vmem:[%s1530_s8 + $0x20] ss:$8 sps:$4 sm:$0xff] (!%p523_p9)  }
  0x40   : > { %668 = vmatpush1.bf16.msra.mxu0 %v1329_v45  ;;  %771 = vmatpush1.bf16.msra.mxu1 %v1330_v46  ;;  %v1336_v50 = vld [vmem:[%s1534_s9 + $0x10] ss:$8 sps:$4 sm:$0xff]   ;;  %v1339_v52 = vld [vmem:[%s1534_s9 + $0x24] ss:$8 sps:$4 sm:$0xff]   ;;  %v1342_v54 = vld [vmem:[%s1534_s9 + $0x20] ss:$8 sps:$4 sm:$0xff]  }
  0x41   : > { %669 = vmatprep.subr.bf16.mxu0 %v1331_v47  ;;  %772 = vmatprep.subr.bf16.mxu1 %v1333_v48  ;;  %v1343_v55 = vld [vmem:[%s1530_s8 + $0x34] ss:$8 sps:$4 sm:$0xff]   ;;  %v1347_v57 = vld [vmem:[%s1530_s8 + $0x30] ss:$8 sps:$4 sm:$0xff]   ;;  %v1349_v59 = vld [vmem:[%s1530_s8 + $0x44] ss:$8 sps:$4 sm:$0xff]  }
  0x42   : > { %v1345_v56 = vld [vmem:[%s1534_s9 + $0x34] ss:$8 sps:$4 sm:$0xff]   ;;  %v1348_v58 = vld [vmem:[%s1534_s9 + $0x30] ss:$8 sps:$4 sm:$0xff]   ;;  %v1351_v60 = vld [vmem:[%s1534_s9 + $0x44] ss:$8 sps:$4 sm:$0xff]  }
  0x43   : > { %s1554_s10 = scalar_lea.vmem [#allocation4], %s1518_s19  ;;  %s1557_s11 = scalar_lea.vmem [#allocation5], %s1518_s19  ;;  %v1353_v61 = vld [vmem:[%s1530_s8 + $0x40] ss:$8 sps:$4 sm:$0xff]  }
  0x44   : > { %670 = vmatpush1.bf16.msra.mxu0 %v1335_v49  ;;  %773 = vmatpush1.bf16.msra.mxu1 %v1336_v50  ;;  %v1354_v62 = vld [vmem:[%s1534_s9 + $0x40] ss:$8 sps:$4 sm:$0xff]   ;;  %v1358_v63 = vld [vmem:[%s1554_s10 + $0x4] ss:$8 sps:$4 sm:$0xff]   ;;  %v1364_v4 = vld [vmem:[%s1554_s10 + $0x14] ss:$8 sps:$4 sm:$0xff]  }
  0x45   : > { %671 = vmatprep.subr.bf16.mxu0 %v1337_v51  ;;  %774 = vmatprep.subr.bf16.mxu1 %v1339_v52  ;;  %v1361_v0 = vld [vmem:[%s1557_s11 + $0x4] ss:$8 sps:$4 sm:$0xff]   ;;  %v1356_v2 = vld [vmem:[%s1554_s10] ss:$8 sps:$4 sm:$0xff]   ;;  %v1367_v5 = vld [vmem:[%s1557_s11 + $0x14] ss:$8 sps:$4 sm:$0xff]  }
  0x46   : > { %v1359_v3 = vld [vmem:[%s1557_s11] ss:$8 sps:$4 sm:$0xff]   ;;  %v1362_v6 = vld [vmem:[%s1554_s10 + $0x10] ss:$8 sps:$4 sm:$0xff]   ;;  %v1370_v8 = vld [vmem:[%s1554_s10 + $0x24] ss:$8 sps:$4 sm:$0xff]  }
  0x47   : > { %v1365_v7 = vld [vmem:[%s1557_s11 + $0x10] ss:$8 sps:$4 sm:$0xff]   ;;  %v1373_v9 = vld [vmem:[%s1557_s11 + $0x24] ss:$8 sps:$4 sm:$0xff]   ;;  %v1368_v10 = vld [vmem:[%s1554_s10 + $0x20] ss:$8 sps:$4 sm:$0xff]  }
  0x48   : > { %672 = vmatpush1.bf16.msra.mxu0 %v1341_v53  ;;  %775 = vmatpush1.bf16.msra.mxu1 %v1342_v54  ;;  %v1371_v11 = vld [vmem:[%s1557_s11 + $0x20] ss:$8 sps:$4 sm:$0xff]   ;;  %v1376_v12 = vld [vmem:[%s1554_s10 + $0x34] ss:$8 sps:$4 sm:$0xff]   ;;  %v1374_v14 = vld [vmem:[%s1554_s10 + $0x30] ss:$8 sps:$4 sm:$0xff]  }
  0x49   : > { %673 = vmatprep.subr.bf16.mxu0 %v1343_v55  ;;  %776 = vmatprep.subr.bf16.mxu1 %v1345_v56  ;;  %v1379_v13 = vld [vmem:[%s1557_s11 + $0x34] ss:$8 sps:$4 sm:$0xff]   ;;  %v1377_v15 = vld [vmem:[%s1557_s11 + $0x30] ss:$8 sps:$4 sm:$0xff]   ;;  %v1382_v16 = vld [vmem:[%s1554_s10 + $0x44] ss:$8 sps:$4 sm:$0xff]  }
  0x4a   : > { %v1385_v17 = vld [vmem:[%s1557_s11 + $0x44] ss:$8 sps:$4 sm:$0xff]   ;;  %v1380_v18 = vld [vmem:[%s1554_s10 + $0x40] ss:$8 sps:$4 sm:$0xff]   ;;  %s1293_s21 = sshll.u32 (%p1480_p5), %s1221_s24, 3 }
  0x4b   : > { %v1383_v19 = vld [vmem:[%s1557_s11 + $0x40] ss:$8 sps:$4 sm:$0xff]   ;;  %s1074_s18 = scalar_lea.vmem (%p1480_p5), %s1615_s6, %s1293_s21 }
  0x4c   : > { %674 = vmatpush1.bf16.msra.mxu0 %v1347_v57  ;;  %777 = vmatpush1.bf16.msra.mxu1 %v1348_v58 }
  0x4d   : > { %675 = vmatprep.subr.bf16.mxu0 %v1349_v59  ;;  %778 = vmatprep.subr.bf16.mxu1 %v1351_v60 }
  0x50   : > { %676 = vmatpush1.bf16.msra.mxu0 %v1353_v61  ;;  %779 = vmatpush1.bf16.msra.mxu1 %v1354_v62 }
  0x51   : > { %877 = vmatprep.subr.bf16.mxu0 %v1358_v63  ;;  %980 = vmatprep.subr.bf16.mxu1 %v1361_v0 }
  0x53   : > { %1246 = vmatmul.mubr.msk.bf16.vlgmr.msra.gmra.mrb[0].mxu0 %vm663_vm0, %v1355_v1  ;;  %1257 = vmatmul.mubr.msk.bf16.vlgmr.msra.gmra.mrb[0].mxu1 %vm663_vm0, %v1355_v1 }
  0x54   : > { %878 = vmatpush1.bf16.msra.mxu0 %v1356_v2  ;;  %981 = vmatpush1.bf16.msra.mxu1 %v1359_v3 }
  0x55   : > { %879 = vmatprep.subr.bf16.mxu0 %v1364_v4  ;;  %982 = vmatprep.subr.bf16.mxu1 %v1367_v5 }
  0x56   : > { %909 = vmatprep.mubr.bf16.mxu0 %v1410_v40  ;;  %1012 = vmatprep.mubr.bf16.mxu1 %v1410_v40 }
  0x58   : > { %880 = vmatpush1.bf16.msra.mxu0 %v1362_v6  ;;  %983 = vmatpush1.bf16.msra.mxu1 %v1365_v7 }
  0x59   : > { %881 = vmatprep.subr.bf16.mxu0 %v1370_v8  ;;  %984 = vmatprep.subr.bf16.mxu1 %v1373_v9 }
  0x5c   : > { %882 = vmatpush1.bf16.msra.mxu0 %v1368_v10  ;;  %985 = vmatpush1.bf16.msra.mxu1 %v1371_v11 }
  0x5d   : > { %883 = vmatprep.subr.bf16.mxu0 %v1376_v12  ;;  %986 = vmatprep.subr.bf16.mxu1 %v1379_v13 }
  0x60   : > { %884 = vmatpush1.bf16.msra.mxu0 %v1374_v14  ;;  %987 = vmatpush1.bf16.msra.mxu1 %v1377_v15 }
  0x61   : > { %885 = vmatprep.subr.bf16.mxu0 %v1382_v16  ;;  %988 = vmatprep.subr.bf16.mxu1 %v1385_v17 }
  0x64   : > { %886 = vmatpush1.bf16.msra.mxu0 %v1380_v18  ;;  %989 = vmatpush1.bf16.msra.mxu1 %v1383_v19 }
  0x67   : > { %1268 = vmatmul.mubr.msk.bf16.vlgmr.msra.gmra.mrb[4].mxu0 %vm663_vm0, %v1355_v1  ;;  %1279 = vmatmul.mubr.msk.bf16.vlgmr.msra.gmra.mrb[4].mxu1 %vm663_vm0, %v1355_v1 }
  0xba   : > { %v1036_v32 = vpop.permute.xlu0 %1035 }
  0xbe   : > { %v1041_v50 = vpop.permute.xlu0 %1040 }
 0x126   : > { %v701_v20 = vpop.f32.mrb[0].mxu0  ;;  %v804_v21 = vpop.f32.mrb[0].mxu1 }
 0x127   : > { %v813_v22 = vmax.f32 %v701_v20, %v804_v21  ;;  %v703_v23 = vpop.f32.mrb[1].mxu0  ;;  %v806_v24 = vpop.f32.mrb[1].mxu1 }
 0x128   : > { %v814_v25 = vmax.f32 %v703_v23, %v806_v24  ;;  %v705_v26 = vpop.f32.mrb[2].mxu0  ;;  %v808_v27 = vpop.f32.mrb[2].mxu1 }
 0x129   : > { %v815_v28 = vmax.f32 %v705_v26, %v808_v27  ;;  %v707_v29 = vpop.f32.mrb[3].mxu0  ;;  %v810_v30 = vpop.f32.mrb[3].mxu1 }
 0x12a   : > { %v816_v31 = vmax.f32 %v707_v29, %v810_v30 }
 0x13a   : > { %v911_v33 = vpop.f32.mrb[4].mxu0  ;;  %v1014_v34 = vpop.f32.mrb[4].mxu1 }
 0x13b   : > { %v1023_v35 = vmax.f32 %v911_v33, %v1014_v34  ;;  %v913_v36 = vpop.f32.mrb[5].mxu0  ;;  %v1016_v37 = vpop.f32.mrb[5].mxu1 }
 0x13c   : > { %v1024_v38 = vmax.f32 %v913_v36, %v1016_v37  ;;  %v915_v39 = vpop.f32.mrb[6].mxu0  ;;  %v1018_v40 = vpop.f32.mrb[6].mxu1 }
 0x13d   : > { %v1027_v41 = vmax.f32 %v813_v22, %v1023_v35  ;;  %v1025_v42 = vmax.f32 %v915_v39, %v1018_v40  ;;  %v917_v43 = vpop.f32.mrb[7].mxu0  ;;  %v1020_v44 = vpop.f32.mrb[7].mxu1 }
 0x13e   : > { %v1028_v45 = vmax.f32 %v814_v25, %v1024_v38  ;;  %v1026_v46 = vmax.f32 %v917_v43, %v1020_v44 }
 0x13f   : > { %v1043_v47 = vadd.f32 %v1036_v32, %v1027_v41  ;;  %v1029_v48 = vmax.f32 %v815_v28, %v1025_v42 }
 0x140   : > { %v1044_v49 = vadd.f32 %v1036_v32, %v1028_v45  ;;  %v1030_v51 = vmax.f32 %v816_v31, %v1026_v46 }
 0x141   : > { %v1047_v52 = vmax.f32 %v1043_v47, 0.0  ;;  %v1045_v53 = vadd.f32 %v1041_v50, %v1029_v48 }
 0x142   : > { %v1048_v54 = vmax.f32 %v1044_v49, 0.0  ;;  %v1046_v55 = vadd.f32 %v1041_v50, %v1030_v51  ;;  %1071 = sbr.rel (!%p1480_p5) target bundleno = 337 (0x151), region = 200 }
 0x143   : > { %v1049_v56 = vmax.f32 %v1045_v53, 0.0 }
 0x144   : > { %v1291_v57 = vpack.c.bf16 %v1048_v54, %v1047_v52  ;;  %v1050_v58 = vmax.f32 %v1046_v55, 0.0 }
 0x146   : > { %1063 = vst [vmem:[%s589_s15] sm:$0xff] %v1291_v57  ;;  %v1292_v59 = vpack.c.bf16 %v1050_v58, %v1049_v56 }
 0x148   : > { %1064 = vst [vmem:[%s589_s15 + $0x8] sm:$0xff] %v1292_v59 }
 0x14d   : > { %v1104_v60 = vld [vmem:[%s589_s15] sm:$0xff] }
 0x14e   : > { %1105 = vst [vmem:[%s1074_s18] sm:$0xff] %v1104_v60 }
 0x14f   : > { %v1106_v61 = vld [vmem:[%s589_s15 + $0x8] sm:$0xff] }
 0x150   : > { %1107 = vst [vmem:[%s1074_s18 + $0x10] sm:$0xff] %v1106_v61 }
 0x151 PF: > { %p13_p10 = scmp.ge.s32.totalorder %s1463_s25, 4   ;;  %s1618_s21 = smov %s1404_s22 }
 0x152   : > { %s1619_s22 = smov %s1474_s28  ;;  %s1620_s23 = smov %s1463_s25 }
 0x153   :  { %15 = sbr.rel (!%p13_p10) target bundleno = 2 (0x2), region = 293 }

// kernel: cnn2_forward.4
= control target key start
LH: loop header
LB: loop body
LE: loop exit
PB: predicated region body
PF: predicated region fallthrough
CT: control target
= control target key end

     0   :  { %v659_v0 = vmov 0   ;;  %vm115_vm0 = vcmask 261120   ;;  %s881_s0 = inlined_call_operand.vmem [shape: bf16[160,128], index: 0, kind: input, shape index: {}]   ;;  %s882_s1 = inlined_call_operand.vmem [shape: bf16[160,128], index: 1, kind: input, shape index: {}]   ;;  %s883_s4 = inlined_call_operand.vmem [shape: bf16[16,160], index: 4, kind: input, shape index: {}]   ;;  %s884_s2 = inlined_call_operand.vmem [shape: bf16[160,128], index: 2, kind: input, shape index: {}]   ;;  %s885_s3 = inlined_call_operand.vmem [shape: bf16[160,128], index: 3, kind: input, shape index: {}]   ;;  %s886_s5 = inlined_call_operand.vmem [shape: f32[16,1], index: 5, kind: input, shape index: {}]   ;;  %s887_s6 = inlined_call_operand.vmem [shape: bf16[16,128], index: 6, kind: output, shape index: {}]  }
   0x1   :  { %119 = vmatprep.subr.bf16.mxu0 %v659_v0  ;;  %240 = vmatprep.subr.bf16.mxu1 %v659_v0  ;;  %v616_v1 = vld [vmem:[%s881_s0] sm:$0xff]   ;;  %v618_v3 = vld [vmem:[%s881_s0 + $0x8] sm:$0xff]   ;;  %v620_v5 = vld [vmem:[%s881_s0 + $0x10] sm:$0xff]  }
   0x2   :  { %v617_v2 = vld [vmem:[%s882_s1] sm:$0xff]   ;;  %615 = vset.pattern.permute.xlu0 %v659_v0  ;;  %120 = vmatpush1.bf16.msra.mxu0 %v616_v1  ;;  %v619_v4 = vld [vmem:[%s882_s1 + $0x8] sm:$0xff]   ;;  %v621_v6 = vld [vmem:[%s882_s1 + $0x10] sm:$0xff]  }
   0x3   :  { %241 = vmatpush1.bf16.msra.mxu1 %v617_v2  ;;  %121 = vmatprep.subr.bf16.mxu0 %v659_v0  ;;  %v622_v7 = vld [vmem:[%s881_s0 + $0x18] sm:$0xff]   ;;  %v624_v9 = vld [vmem:[%s881_s0 + $0x20] sm:$0xff]   ;;  %v626_v11 = vld [vmem:[%s881_s0 + $0x28] sm:$0xff]  }
   0x4   :  { %242 = vmatprep.subr.bf16.mxu1 %v659_v0  ;;  %v623_v8 = vld [vmem:[%s882_s1 + $0x18] sm:$0xff]   ;;  %v625_v10 = vld [vmem:[%s882_s1 + $0x20] sm:$0xff]   ;;  %v627_v12 = vld [vmem:[%s882_s1 + $0x28] sm:$0xff]  }
   0x5   :  { %v636_v13 = vld [vmem:[%s883_s4 + $0x4] ss:$8 sps:$4 sm:$0xff]   ;;  %v628_v14 = vld [vmem:[%s881_s0 + $0x30] sm:$0xff]   ;;  %v630_v16 = vld [vmem:[%s881_s0 + $0x38] sm:$0xff]  }
   0x6   :  { %122 = vmatpush1.bf16.msra.mxu0 %v618_v3  ;;  %571 = vmatprep.mubr.msk.bf16.mxu0 %vm115_vm0, %v636_v13  ;;  %v629_v15 = vld [vmem:[%s882_s1 + $0x30] sm:$0xff]   ;;  %v631_v17 = vld [vmem:[%s882_s1 + $0x38] sm:$0xff]   ;;  %v632_v18 = vld [vmem:[%s881_s0 + $0x40] sm:$0xff]  }
   0x7   :  { %243 = vmatpush1.bf16.msra.mxu1 %v619_v4  ;;  %123 = vmatprep.subr.bf16.mxu0 %v659_v0  ;;  %v633_v19 = vld [vmem:[%s882_s1 + $0x40] sm:$0xff]   ;;  %v634_v20 = vld [vmem:[%s881_s0 + $0x48] sm:$0xff]   ;;  %v643_v28 = vld [vmem:[%s884_s2 + $0x10] sm:$0xff]  }
   0x8   :  { %244 = vmatprep.subr.bf16.mxu1 %v659_v0  ;;  %582 = vmatprep.mubr.msk.bf16.mxu1 %vm115_vm0, %v636_v13  ;;  %v635_v21 = vld [vmem:[%s882_s1 + $0x48] sm:$0xff]   ;;  %v639_v23 = vld [vmem:[%s884_s2] sm:$0xff]   ;;  %v644_v30 = vld [vmem:[%s885_s3 + $0x10] sm:$0xff]  }
   0x9   :  { %v784_v22 = vld [vmem:[%s883_s4] ss:$8 sps:$4 sm:$0xff]   ;;  %v645_v31 = vld [vmem:[%s884_s2 + $0x18] sm:$0xff]   ;;  %v651_v37 = vld [vmem:[%s884_s2 + $0x30] sm:$0xff]  }
   0xa   :  { %124 = vmatpush1.bf16.msra.mxu0 %v620_v5  ;;  %v640_v24 = vld [vmem:[%s885_s3] sm:$0xff]   ;;  %v641_v25 = vld [vmem:[%s884_s2 + $0x8] sm:$0xff]   ;;  %v646_v32 = vld [vmem:[%s885_s3 + $0x18] sm:$0xff]  }
   0xb   :  { %245 = vmatpush1.bf16.msra.mxu1 %v621_v6  ;;  %125 = vmatprep.subr.bf16.mxu0 %v659_v0  ;;  %v529_v26 = vld [vmem:[%s886_s5] sm:$0xff]  ;;  %v642_v27 = vld [vmem:[%s885_s3 + $0x8] sm:$0xff]   ;;  %v652_v38 = vld [vmem:[%s885_s3 + $0x30] sm:$0xff]  }
   0xc   :  { %246 = vmatprep.subr.bf16.mxu1 %v659_v0  ;;  %533 = vperm.xlu0 %615, %v529_v26   ;;  %v530_v29 = vld [vmem:[%s886_s5 + $0x8] sm:$0xff]  ;;  %v647_v33 = vld [vmem:[%s884_s2 + $0x20] sm:$0xff]   ;;  %v653_v39 = vld [vmem:[%s884_s2 + $0x38] sm:$0xff]  }
   0xd   :  { %v648_v34 = vld [vmem:[%s885_s3 + $0x20] sm:$0xff]   ;;  %v649_v35 = vld [vmem:[%s884_s2 + $0x28] sm:$0xff]   ;;  %v654_v40 = vld [vmem:[%s885_s3 + $0x38] sm:$0xff]  }
   0xe   :  { %126 = vmatpush1.bf16.msra.mxu0 %v622_v7  ;;  %v650_v36 = vld [vmem:[%s885_s3 + $0x28] sm:$0xff]   ;;  %v655_v41 = vld [vmem:[%s884_s2 + $0x40] sm:$0xff]  }
   0xf   :  { %247 = vmatpush1.bf16.msra.mxu1 %v623_v8  ;;  %127 = vmatprep.subr.bf16.mxu0 %v659_v0  ;;  %v656_v42 = vld [vmem:[%s885_s3 + $0x40] sm:$0xff]   ;;  %v657_v43 = vld [vmem:[%s884_s2 + $0x48] sm:$0xff]  }
  0x10   :  { %248 = vmatprep.subr.bf16.mxu1 %v659_v0  ;;  %538 = vperm.xlu0 %615, %v530_v29   ;;  %v658_v44 = vld [vmem:[%s885_s3 + $0x48] sm:$0xff]  }
  0x12   :  { %128 = vmatpush1.bf16.msra.mxu0 %v624_v9 }
  0x13   :  { %249 = vmatpush1.bf16.msra.mxu1 %v625_v10  ;;  %129 = vmatprep.subr.bf16.mxu0 %v659_v0 }
  0x14   :  { %250 = vmatprep.subr.bf16.mxu1 %v659_v0 }
  0x16   :  { %130 = vmatpush1.bf16.msra.mxu0 %v626_v11 }
  0x17   :  { %251 = vmatpush1.bf16.msra.mxu1 %v627_v12  ;;  %131 = vmatprep.subr.bf16.mxu0 %v659_v0 }
  0x18   :  { %252 = vmatprep.subr.bf16.mxu1 %v659_v0 }
  0x1a   :  { %132 = vmatpush1.bf16.msra.mxu0 %v628_v14 }
  0x1b   :  { %253 = vmatpush1.bf16.msra.mxu1 %v629_v15  ;;  %133 = vmatprep.subr.bf16.mxu0 %v659_v0 }
  0x1c   :  { %254 = vmatprep.subr.bf16.mxu1 %v659_v0 }
  0x1e   :  { %134 = vmatpush1.bf16.msra.mxu0 %v630_v16 }
  0x1f   :  { %255 = vmatpush1.bf16.msra.mxu1 %v631_v17  ;;  %135 = vmatprep.subr.bf16.mxu0 %v659_v0 }
  0x20   :  { %256 = vmatprep.subr.bf16.mxu1 %v659_v0 }
  0x22   :  { %136 = vmatpush1.bf16.msra.mxu0 %v632_v18 }
  0x23   :  { %257 = vmatpush1.bf16.msra.mxu1 %v633_v19  ;;  %137 = vmatprep.subr.bf16.mxu0 %v659_v0 }
  0x24   :  { %258 = vmatprep.subr.bf16.mxu1 %v659_v0 }
  0x26   :  { %138 = vmatpush1.bf16.msra.mxu0 %v634_v20 }
  0x27   :  { %259 = vmatpush1.bf16.msra.mxu1 %v635_v21  ;;  %363 = vmatprep.subr.bf16.mxu0 %v659_v0 }
  0x28   :  { %484 = vmatprep.subr.bf16.mxu1 %v659_v0 }
  0x29   :  { %152 = vmatmul.mubr.bf16.vlgmr.msra.gmra.mrb[0].mxu0 %v784_v22 }
  0x2a   :  { %273 = vmatmul.mubr.bf16.vlgmr.msra.gmra.mrb[0].mxu1 %v784_v22  ;;  %364 = vmatpush1.bf16.msra.mxu0 %v639_v23 }
  0x2b   :  { %485 = vmatpush1.bf16.msra.mxu1 %v640_v24  ;;  %365 = vmatprep.subr.bf16.mxu0 %v659_v0 }
  0x2c   :  { %486 = vmatprep.subr.bf16.mxu1 %v659_v0  ;;  %593 = vmatprep.mubr.msk.bf16.mxu0 %vm115_vm0, %v636_v13 }
  0x2d   :  { %604 = vmatprep.mubr.msk.bf16.mxu1 %vm115_vm0, %v636_v13 }
  0x2e   :  { %366 = vmatpush1.bf16.msra.mxu0 %v641_v25 }
  0x2f   :  { %487 = vmatpush1.bf16.msra.mxu1 %v642_v27  ;;  %367 = vmatprep.subr.bf16.mxu0 %v659_v0 }
  0x30   :  { %488 = vmatprep.subr.bf16.mxu1 %v659_v0 }
  0x32   :  { %368 = vmatpush1.bf16.msra.mxu0 %v643_v28 }
  0x33   :  { %489 = vmatpush1.bf16.msra.mxu1 %v644_v30  ;;  %369 = vmatprep.subr.bf16.mxu0 %v659_v0 }
  0x34   :  { %490 = vmatprep.subr.bf16.mxu1 %v659_v0 }
  0x36   :  { %370 = vmatpush1.bf16.msra.mxu0 %v645_v31 }
  0x37   :  { %491 = vmatpush1.bf16.msra.mxu1 %v646_v32  ;;  %371 = vmatprep.subr.bf16.mxu0 %v659_v0 }
  0x38   :  { %492 = vmatprep.subr.bf16.mxu1 %v659_v0 }
  0x3a   :  { %372 = vmatpush1.bf16.msra.mxu0 %v647_v33 }
  0x3b   :  { %493 = vmatpush1.bf16.msra.mxu1 %v648_v34  ;;  %373 = vmatprep.subr.bf16.mxu0 %v659_v0 }
  0x3c   :  { %494 = vmatprep.subr.bf16.mxu1 %v659_v0 }
  0x3e   :  { %374 = vmatpush1.bf16.msra.mxu0 %v649_v35 }
  0x3f   :  { %495 = vmatpush1.bf16.msra.mxu1 %v650_v36  ;;  %375 = vmatprep.subr.bf16.mxu0 %v659_v0 }
  0x40   :  { %496 = vmatprep.subr.bf16.mxu1 %v659_v0 }
  0x42   :  { %376 = vmatpush1.bf16.msra.mxu0 %v651_v37 }
  0x43   :  { %497 = vmatpush1.bf16.msra.mxu1 %v652_v38  ;;  %377 = vmatprep.subr.bf16.mxu0 %v659_v0 }
  0x44   :  { %498 = vmatprep.subr.bf16.mxu1 %v659_v0 }
  0x46   :  { %378 = vmatpush1.bf16.msra.mxu0 %v653_v39 }
  0x47   :  { %499 = vmatpush1.bf16.msra.mxu1 %v654_v40  ;;  %379 = vmatprep.subr.bf16.mxu0 %v659_v0 }
  0x48   :  { %500 = vmatprep.subr.bf16.mxu1 %v659_v0 }
  0x4a   :  { %380 = vmatpush1.bf16.msra.mxu0 %v655_v41 }
  0x4b   :  { %501 = vmatpush1.bf16.msra.mxu1 %v656_v42  ;;  %381 = vmatprep.subr.bf16.mxu0 %v659_v0 }
  0x4c   :  { %502 = vmatprep.subr.bf16.mxu1 %v659_v0 }
  0x4e   :  { %382 = vmatpush1.bf16.msra.mxu0 %v657_v43 }
  0x4f   :  { %503 = vmatpush1.bf16.msra.mxu1 %v658_v44 }
  0x51   :  { %396 = vmatmul.mubr.bf16.vlgmr.msra.gmra.mrb[4].mxu0 %v784_v22 }
  0x52   :  { %517 = vmatmul.mubr.bf16.vlgmr.msra.gmra.mrb[4].mxu1 %v784_v22 }
  0x8b   :  { %v534_v55 = vpop.permute.xlu0 %533 }
  0x8f   :  { %v539_v5 = vpop.permute.xlu0 %538 }
  0xfc   :  { %v153_v45 = vpop.f32.mrb[0].mxu0 }
  0xfd   :  { %v274_v46 = vpop.f32.mrb[0].mxu1  ;;  %v155_v47 = vpop.f32.mrb[1].mxu0 }
  0xfe   :  { %v281_v48 = vmax.f32 %v153_v45, %v274_v46  ;;  %v276_v49 = vpop.f32.mrb[1].mxu1  ;;  %v156_v50 = vpop.f32.mrb[2].mxu0 }
  0xff   :  { %v277_v51 = vpop.f32.mrb[2].mxu1  ;;  %v158_v52 = vpop.f32.mrb[3].mxu0 }
 0x100   :  { %v282_v53 = vmax.f32 %v156_v50, %v277_v51  ;;  %v279_v54 = vpop.f32.mrb[3].mxu1 }
 0x124   :  { %v397_v56 = vpop.f32.mrb[4].mxu0 }
 0x125   :  { %v518_v57 = vpop.f32.mrb[4].mxu1  ;;  %v399_v58 = vpop.f32.mrb[5].mxu0 }
 0x126   :  { %v525_v59 = vmax.f32 %v397_v56, %v518_v57  ;;  %v520_v60 = vpop.f32.mrb[5].mxu1  ;;  %v400_v61 = vpop.f32.mrb[6].mxu0 }
 0x127   :  { %v521_v62 = vpop.f32.mrb[6].mxu1  ;;  %v402_v63 = vpop.f32.mrb[7].mxu0 }
 0x128   :  { %v527_v0 = vmax.f32 %v281_v48, %v525_v59  ;;  %v526_v1 = vmax.f32 %v400_v61, %v521_v62  ;;  %v523_v2 = vpop.f32.mrb[7].mxu1 }
 0x12a   :  { %v541_v3 = vadd.f32 %v534_v55, %v527_v0  ;;  %v528_v4 = vmax.f32 %v282_v53, %v526_v1 }
 0x12c   :  { %v542_v6 = vadd.f32 %v539_v5, %v528_v4  ;;  %v543_v7 = vmax.f32 %v541_v3, 0.0 }
 0x12e   :  { %v544_v8 = vmax.f32 %v542_v6, 0.0 }
 0x130   :  { %v612_v9 = vpack.c.bf16 %v544_v8, %v543_v7 }
 0x132   :  { %613 = vst [vmem:[%s887_s6] sm:$0xff] %v612_v9  }

// kernel: cnn2_forward.5
= control target key start
LH: loop header
LB: loop body
LE: loop exit
PB: predicated region body
PF: predicated region fallthrough
CT: control target
= control target key end

     0   :  { %v1509_v1 = vmov 0   ;;  %vm1511_vm0 = vmmov 0   ;;  %s1888_s0 = inlined_call_operand.vmem [shape: bf16[512,128], index: 0, kind: input, shape index: {}]   ;;  %s1889_s1 = inlined_call_operand.vmem [shape: bf16[128,512], index: 1, kind: input, shape index: {}]   ;;  %s1890_s2 = inlined_call_operand.vmem [shape: f32[128,1], index: 2, kind: input, shape index: {}]   ;;  %s1891_s4 = inlined_call_operand.vmem [shape: f32[128,1], index: 4, kind: input, shape index: {}]   ;;  %s1892_s6 = inlined_call_operand.vmem [shape: f32[16,1], index: 6, kind: input, shape index: {}]   ;;  %s1893_s3 = inlined_call_operand.vmem [shape: bf16[128,128], index: 3, kind: input, shape index: {}]   ;;  %s1894_s5 = inlined_call_operand.vmem [shape: bf16[16,128], index: 5, kind: input, shape index: {}]   ;;  %s1895_s7 = inlined_call_operand.vmem [shape: f32[16,128], index: 7, kind: output, shape index: {}]  }
   0x1   :  { %v1420_v0 = vld [vmem:[%s1888_s0 + $0x40] sm:$0xff]   ;;  %1418 = vset.pattern.permute.xlu0 %v1509_v1  ;;  %1419 = vset.pattern.permute.xlu1 %v1509_v1  ;;  %v1424_v5 = vld [vmem:[%s1888_s0 + $0x48] sm:$0xff]   ;;  %v1428_v9 = vld [vmem:[%s1888_s0 + $0x50] sm:$0xff]  }
   0x2   :  { %v1421_v2 = vld [vmem:[%s1888_s0 + $0xc0] sm:$0xff]   ;;  %1210 = vmatprep.subr.bf16.mxu0 %v1420_v0  ;;  %v1425_v6 = vld [vmem:[%s1888_s0 + $0xc8] sm:$0xff]   ;;  %v1429_v10 = vld [vmem:[%s1888_s0 + $0xd0] sm:$0xff]  }
   0x3   :  { %v1422_v3 = vld [vmem:[%s1888_s0] sm:$0xff]   ;;  %1274 = vmatprep.subr.bf16.mxu1 %v1421_v2  ;;  %v1426_v7 = vld [vmem:[%s1888_s0 + $0x8] sm:$0xff]   ;;  %v1430_v11 = vld [vmem:[%s1888_s0 + $0x10] sm:$0xff]  }
   0x4   :  { %v1423_v4 = vld [vmem:[%s1888_s0 + $0x80] sm:$0xff]   ;;  %1211 = vmatpush3.bf16.msra.mxu0 %v1422_v3  ;;  %v1427_v8 = vld [vmem:[%s1888_s0 + $0x88] sm:$0xff]   ;;  %v1431_v12 = vld [vmem:[%s1888_s0 + $0x90] sm:$0xff]  }
   0x5   :  { %1275 = vmatpush3.bf16.msra.mxu1 %v1423_v4  ;;  %1212 = vmatprep.subr.bf16.mxu0 %v1424_v5  ;;  %v1432_v13 = vld [vmem:[%s1888_s0 + $0x58] sm:$0xff]   ;;  %v1436_v17 = vld [vmem:[%s1888_s0 + $0x60] sm:$0xff]   ;;  %v1440_v21 = vld [vmem:[%s1888_s0 + $0x68] sm:$0xff]  }
   0x6   :  { %1276 = vmatprep.subr.bf16.mxu1 %v1425_v6  ;;  %v1433_v14 = vld [vmem:[%s1888_s0 + $0xd8] sm:$0xff]   ;;  %v1437_v18 = vld [vmem:[%s1888_s0 + $0xe0] sm:$0xff]   ;;  %v1441_v22 = vld [vmem:[%s1888_s0 + $0xe8] sm:$0xff]  }
   0x7   :  { %v1434_v15 = vld [vmem:[%s1888_s0 + $0x18] sm:$0xff]   ;;  %v1438_v19 = vld [vmem:[%s1888_s0 + $0x20] sm:$0xff]   ;;  %v1442_v23 = vld [vmem:[%s1888_s0 + $0x28] sm:$0xff]  }
   0x8   :  { %1213 = vmatpush3.bf16.msra.mxu0 %v1426_v7  ;;  %v1435_v16 = vld [vmem:[%s1888_s0 + $0x98] sm:$0xff]   ;;  %v1439_v20 = vld [vmem:[%s1888_s0 + $0xa0] sm:$0xff]   ;;  %v1443_v24 = vld [vmem:[%s1888_s0 + $0xa8] sm:$0xff]  }
   0x9   :  { %1277 = vmatpush3.bf16.msra.mxu1 %v1427_v8  ;;  %1214 = vmatprep.subr.bf16.mxu0 %v1428_v9  ;;  %v1444_v25 = vld [vmem:[%s1888_s0 + $0x70] sm:$0xff]   ;;  %v1448_v29 = vld [vmem:[%s1888_s0 + $0x78] sm:$0xff]   ;;  %v123_v47 = vld [vmem:[%s1890_s2] sm:$0xff] }
   0xa   :  { %1278 = vmatprep.subr.bf16.mxu1 %v1429_v10  ;;  %v1445_v26 = vld [vmem:[%s1888_s0 + $0xf0] sm:$0xff]   ;;  %v1449_v30 = vld [vmem:[%s1888_s0 + $0xf8] sm:$0xff]   ;;  %141 = vperm.xlu0 %1418, %v123_v47   ;;  %v124_v49 = vld [vmem:[%s1890_s2 + $0x8] sm:$0xff] }
   0xb   :  { %v1446_v27 = vld [vmem:[%s1888_s0 + $0x30] sm:$0xff]   ;;  %v1450_v31 = vld [vmem:[%s1888_s0 + $0x38] sm:$0xff]   ;;  %v127_v52 = vld [vmem:[%s1890_s2 + $0x20] sm:$0xff] }
   0xc   :  { %1215 = vmatpush3.bf16.msra.mxu0 %v1430_v11  ;;  %v1447_v28 = vld [vmem:[%s1888_s0 + $0xb0] sm:$0xff]   ;;  %v1451_v32 = vld [vmem:[%s1888_s0 + $0xb8] sm:$0xff]   ;;  %v128_v55 = vld [vmem:[%s1890_s2 + $0x28] sm:$0xff] }
   0xd   :  { %1279 = vmatpush3.bf16.msra.mxu1 %v1431_v12  ;;  %1216 = vmatprep.subr.bf16.mxu0 %v1432_v13  ;;  %v1452_v33 = vld [vmem:[%s1889_s1] ss:$16 sps:$4 sm:$0xff]   ;;  %v1454_v34 = vld [vmem:[%s1889_s1 + $0x4] ss:$16 sps:$4 sm:$0xff]   ;;  %v1455_v35 = vld [vmem:[%s1889_s1 + $0x8] ss:$16 sps:$4 sm:$0xff]  }
   0xe   :  { %1280 = vmatprep.subr.bf16.mxu1 %v1433_v14  ;;  %v1457_v36 = vld [vmem:[%s1889_s1 + $0xc] ss:$16 sps:$4 sm:$0xff]   ;;  %603 = vmatprep.mubr.bf16.mxu0 %v1454_v34  ;;  %v1458_v37 = vld [vmem:[%s1889_s1 + $0x24] ss:$16 sps:$4 sm:$0xff]   ;;  %v1462_v39 = vld [vmem:[%s1889_s1 + $0x20] ss:$16 sps:$4 sm:$0xff]  }
   0xf   :  { %700 = vmatprep.mubr.bf16.mxu1 %v1457_v36  ;;  %v1460_v38 = vld [vmem:[%s1889_s1 + $0x2c] ss:$16 sps:$4 sm:$0xff]   ;;  %v1463_v40 = vld [vmem:[%s1889_s1 + $0x28] ss:$16 sps:$4 sm:$0xff]   ;;  %v1464_v41 = vld [vmem:[%s1889_s1 + $0x44] ss:$16 sps:$4 sm:$0xff]   ;;  %146 = vperm.xlu0 %1418, %v124_v49  }
  0x10   :  { %1217 = vmatpush3.bf16.msra.mxu0 %v1434_v15  ;;  %v1466_v42 = vld [vmem:[%s1889_s1 + $0x4c] ss:$16 sps:$4 sm:$0xff]   ;;  %v1468_v43 = vld [vmem:[%s1889_s1 + $0x40] ss:$16 sps:$4 sm:$0xff]   ;;  %v1469_v44 = vld [vmem:[%s1889_s1 + $0x48] ss:$16 sps:$4 sm:$0xff]  }
  0x11   :  { %1281 = vmatpush3.bf16.msra.mxu1 %v1435_v16  ;;  %1218 = vmatprep.subr.bf16.mxu0 %v1436_v17  ;;  %v1470_v45 = vld [vmem:[%s1889_s1 + $0x64] ss:$16 sps:$4 sm:$0xff]   ;;  %v1472_v46 = vld [vmem:[%s1889_s1 + $0x6c] ss:$16 sps:$4 sm:$0xff]   ;;  %v1474_v51 = vld [vmem:[%s1889_s1 + $0x60] ss:$16 sps:$4 sm:$0xff]  }
  0x12   :  { %1282 = vmatprep.subr.bf16.mxu1 %v1437_v18  ;;  %v125_v48 = vld [vmem:[%s1890_s2 + $0x10] sm:$0xff]  ;;  %v126_v50 = vld [vmem:[%s1890_s2 + $0x18] sm:$0xff]  ;;  %v131_v60 = vld [vmem:[%s1890_s2 + $0x40] sm:$0xff] }
  0x13   :  { %151 = vperm.xlu1 %1419, %v125_v48   ;;  %v1475_v53 = vld [vmem:[%s1889_s1 + $0x68] ss:$16 sps:$4 sm:$0xff]   ;;  %v1476_v54 = vld [vmem:[%s1889_s1 + $0x84] ss:$16 sps:$4 sm:$0xff]   ;;  %v1478_v56 = vld [vmem:[%s1889_s1 + $0x8c] ss:$16 sps:$4 sm:$0xff]   ;;  %161 = vperm.xlu0 %1418, %v127_v52  }
  0x14   :  { %1219 = vmatpush3.bf16.msra.mxu0 %v1438_v19  ;;  %v129_v57 = vld [vmem:[%s1890_s2 + $0x30] sm:$0xff]  ;;  %v130_v58 = vld [vmem:[%s1890_s2 + $0x38] sm:$0xff]  ;;  %v132_v63 = vld [vmem:[%s1890_s2 + $0x48] sm:$0xff] }
  0x15   :  { %1283 = vmatpush3.bf16.msra.mxu1 %v1439_v20  ;;  %1220 = vmatprep.subr.bf16.mxu0 %v1440_v21  ;;  %v1480_v59 = vld [vmem:[%s1889_s1 + $0x80] ss:$16 sps:$4 sm:$0xff]   ;;  %v1481_v61 = vld [vmem:[%s1889_s1 + $0x88] ss:$16 sps:$4 sm:$0xff]   ;;  %v1482_v62 = vld [vmem:[%s1889_s1 + $0xa4] ss:$16 sps:$4 sm:$0xff]  }
  0x16   :  { %1284 = vmatprep.subr.bf16.mxu1 %v1441_v22  ;;  %v1484_v0 = vld [vmem:[%s1889_s1 + $0xac] ss:$16 sps:$4 sm:$0xff]   ;;  %v133_v1 = vld [vmem:[%s1890_s2 + $0x50] sm:$0xff]  ;;  %v135_v4 = vld [vmem:[%s1890_s2 + $0x60] sm:$0xff] }
  0x17   :  { %156 = vperm.xlu1 %1419, %v126_v50   ;;  %171 = vperm.xlu0 %1418, %v129_v57   ;;  %v134_v2 = vld [vmem:[%s1890_s2 + $0x58] sm:$0xff]  ;;  %v1486_v3 = vld [vmem:[%s1889_s1 + $0xa0] ss:$16 sps:$4 sm:$0xff]   ;;  %v1488_v6 = vld [vmem:[%s1889_s1 + $0xc4] ss:$16 sps:$4 sm:$0xff]  }
  0x18   :  { %1221 = vmatpush3.bf16.msra.mxu0 %v1442_v23  ;;  %v1487_v5 = vld [vmem:[%s1889_s1 + $0xa8] ss:$16 sps:$4 sm:$0xff]   ;;  %v1490_v8 = vld [vmem:[%s1889_s1 + $0xcc] ss:$16 sps:$4 sm:$0xff]   ;;  %v137_v9 = vld [vmem:[%s1890_s2 + $0x70] sm:$0xff] }
  0x19   :  { %1285 = vmatpush3.bf16.msra.mxu1 %v1443_v24  ;;  %1222 = vmatprep.subr.bf16.mxu0 %v1444_v25  ;;  %v136_v7 = vld [vmem:[%s1890_s2 + $0x68] sm:$0xff]  ;;  %v138_v10 = vld [vmem:[%s1890_s2 + $0x78] sm:$0xff]  ;;  %v1492_v11 = vld [vmem:[%s1889_s1 + $0xc0] ss:$16 sps:$4 sm:$0xff]  }
  0x1a   :  { %1286 = vmatprep.subr.bf16.mxu1 %v1445_v26  ;;  %v805_v12 = vld [vmem:[%s1891_s4] sm:$0xff]  ;;  %v1493_v13 = vld [vmem:[%s1889_s1 + $0xc8] ss:$16 sps:$4 sm:$0xff]   ;;  %v1496_v16 = vld [vmem:[%s1889_s1 + $0xec] ss:$16 sps:$4 sm:$0xff]  }
  0x1b   :  { %166 = vperm.xlu1 %1419, %v128_v55   ;;  %181 = vperm.xlu0 %1418, %v131_v60   ;;  %v1494_v14 = vld [vmem:[%s1889_s1 + $0xe4] ss:$16 sps:$4 sm:$0xff]   ;;  %v806_v15 = vld [vmem:[%s1891_s4 + $0x8] sm:$0xff]  ;;  %v808_v18 = vld [vmem:[%s1891_s4 + $0x18] sm:$0xff] }
  0x1c   :  { %1223 = vmatpush3.bf16.msra.mxu0 %v1446_v27  ;;  %v807_v17 = vld [vmem:[%s1891_s4 + $0x10] sm:$0xff]  ;;  %v809_v20 = vld [vmem:[%s1891_s4 + $0x20] sm:$0xff]  ;;  %v1499_v21 = vld [vmem:[%s1889_s1 + $0xe8] ss:$16 sps:$4 sm:$0xff]  }
  0x1d   :  { %1287 = vmatpush3.bf16.msra.mxu1 %v1447_v28  ;;  %1224 = vmatprep.subr.bf16.mxu0 %v1448_v29  ;;  %v1498_v19 = vld [vmem:[%s1889_s1 + $0xe0] ss:$16 sps:$4 sm:$0xff]   ;;  %v810_v22 = vld [vmem:[%s1891_s4 + $0x28] sm:$0xff]  ;;  %v812_v24 = vld [vmem:[%s1891_s4 + $0x38] sm:$0xff] }
  0x1e   :  { %1288 = vmatprep.subr.bf16.mxu1 %v1449_v30  ;;  %v811_v23 = vld [vmem:[%s1891_s4 + $0x30] sm:$0xff]  ;;  %v813_v25 = vld [vmem:[%s1891_s4 + $0x40] sm:$0xff]  ;;  %v814_v26 = vld [vmem:[%s1891_s4 + $0x48] sm:$0xff] }
  0x1f   :  { %176 = vperm.xlu1 %1419, %v130_v58   ;;  %191 = vperm.xlu0 %1418, %v133_v1   ;;  %v815_v27 = vld [vmem:[%s1891_s4 + $0x50] sm:$0xff]  ;;  %v816_v28 = vld [vmem:[%s1891_s4 + $0x58] sm:$0xff]  ;;  %v817_v29 = vld [vmem:[%s1891_s4 + $0x60] sm:$0xff] }
  0x20   :  { %1225 = vmatpush3.bf16.msra.mxu0 %v1450_v31  ;;  %v818_v30 = vld [vmem:[%s1891_s4 + $0x68] sm:$0xff]  ;;  %v819_v31 = vld [vmem:[%s1891_s4 + $0x70] sm:$0xff] }
  0x21   :  { %1289 = vmatpush3.bf16.msra.mxu1 %v1451_v32  ;;  %v820_v32 = vld [vmem:[%s1891_s4 + $0x78] sm:$0xff]  ;;  %v1073_v34 = vld [vmem:[%s1892_s6 + $0x8] sm:$0xff] }
  0x23   :  { %604 = vmatmul.mubr.bf16.vlgmr.msra.gmra.mrb[0].mxu0 %v1452_v33  ;;  %186 = vperm.xlu1 %1419, %v132_v63   ;;  %v1072_v33 = vld [vmem:[%s1892_s6] sm:$0xff] }
  0x24   :  { %701 = vmatmul.mubr.bf16.vlgmr.msra.gmra.mrb[0].mxu1 %v1455_v35  ;;  %611 = vmatprep.mubr.bf16.mxu0 %v1458_v37  ;;  %v1500_v35 = vld [vmem:[%s1893_s3] sm:$0xff]  }
  0x25   :  { %708 = vmatprep.mubr.bf16.mxu1 %v1460_v38  ;;  %201 = vperm.xlu0 %1418, %v135_v4  }
  0x27   :  { %196 = vperm.xlu1 %1419, %v134_v2  }
  0x29   :  { %211 = vperm.xlu0 %1418, %v137_v9  }
  0x2b   :  { %612 = vmatmul.mubr.bf16.gmra.mrb[4].mxu0 %v1462_v39  ;;  %206 = vperm.xlu1 %1419, %v136_v7  }
  0x2c   :  { %709 = vmatmul.mubr.bf16.gmra.mrb[4].mxu1 %v1463_v40  ;;  %619 = vmatprep.mubr.bf16.mxu0 %v1464_v41 }
  0x2d   :  { %716 = vmatprep.mubr.bf16.mxu1 %v1466_v42  ;;  %823 = vperm.xlu0 %1418, %v805_v12  }
  0x2f   :  { %216 = vperm.xlu1 %1419, %v138_v10  }
  0x31   :  { %833 = vperm.xlu0 %1418, %v807_v17  }
  0x33   :  { %620 = vmatmul.mubr.bf16.gmra.mrb[8].mxu0 %v1468_v43  ;;  %828 = vperm.xlu1 %1419, %v806_v15  }
  0x34   :  { %717 = vmatmul.mubr.bf16.gmra.mrb[8].mxu1 %v1469_v44  ;;  %627 = vmatprep.mubr.bf16.mxu0 %v1470_v45 }
  0x35   :  { %724 = vmatprep.mubr.bf16.mxu1 %v1472_v46  ;;  %843 = vperm.xlu0 %1418, %v809_v20  }
  0x37   :  { %838 = vperm.xlu1 %1419, %v808_v18  }
  0x39   :  { %853 = vperm.xlu0 %1418, %v811_v23  }
  0x3b   :  { %628 = vmatmul.mubr.bf16.gmra.mrb[12].mxu0 %v1474_v51  ;;  %848 = vperm.xlu1 %1419, %v810_v22  }
  0x3c   :  { %725 = vmatmul.mubr.bf16.gmra.mrb[12].mxu1 %v1475_v53  ;;  %635 = vmatprep.mubr.bf16.mxu0 %v1476_v54 }
  0x3d   :  { %732 = vmatprep.mubr.bf16.mxu1 %v1478_v56  ;;  %863 = vperm.xlu0 %1418, %v813_v25  }
  0x3f   :  { %858 = vperm.xlu1 %1419, %v812_v24  }
  0x41   :  { %873 = vperm.xlu0 %1418, %v815_v27  }
  0x43   :  { %636 = vmatmul.mubr.bf16.gmra.mrb[16].mxu0 %v1480_v59  ;;  %868 = vperm.xlu1 %1419, %v814_v26  }
  0x44   :  { %733 = vmatmul.mubr.bf16.gmra.mrb[16].mxu1 %v1481_v61  ;;  %643 = vmatprep.mubr.bf16.mxu0 %v1482_v62 }
  0x45   :  { %740 = vmatprep.mubr.bf16.mxu1 %v1484_v0  ;;  %883 = vperm.xlu0 %1418, %v817_v29  }
  0x47   :  { %878 = vperm.xlu1 %1419, %v816_v28  }
  0x49   :  { %893 = vperm.xlu0 %1418, %v819_v31  }
  0x4b   :  { %644 = vmatmul.mubr.bf16.gmra.mrb[20].mxu0 %v1486_v3  ;;  %888 = vperm.xlu1 %1419, %v818_v30  }
  0x4c   :  { %741 = vmatmul.mubr.bf16.gmra.mrb[20].mxu1 %v1487_v5  ;;  %651 = vmatprep.mubr.bf16.mxu0 %v1488_v6 }
  0x4d   :  { %748 = vmatprep.mubr.bf16.mxu1 %v1490_v8  ;;  %1076 = vperm.xlu0 %1418, %v1072_v33  }
  0x4f   :  { %898 = vperm.xlu1 %1419, %v820_v32  }
  0x53   :  { %652 = vmatmul.mubr.bf16.gmra.mrb[24].mxu0 %v1492_v11  ;;  %1081 = vperm.xlu1 %1419, %v1073_v34  }
  0x54   :  { %749 = vmatmul.mubr.bf16.gmra.mrb[24].mxu1 %v1493_v13  ;;  %659 = vmatprep.mubr.bf16.mxu0 %v1494_v14 }
  0x55   :  { %756 = vmatprep.mubr.bf16.mxu1 %v1496_v16 }
  0x5b   :  { %660 = vmatmul.mubr.bf16.gmra.mrb[28].mxu0 %v1498_v19 }
  0x5c   :  { %757 = vmatmul.mubr.bf16.gmra.mrb[28].mxu1 %v1499_v21  ;;  %1379 = vmatprep.mubr.bf16.mxu0 %v1500_v35 }
  0x89   :  { %v142_v36 = vpop.permute.xlu0 %141 }
  0x8e   :  { %v147_v49 = vpop.permute.xlu0 %146 }
  0x92   :  { %v152_v53 = vpop.permute.xlu1 %151  ;;  %v162_v10 = vpop.permute.xlu0 %161 }
  0x96   :  { %v157_v6 = vpop.permute.xlu1 %156  ;;  %v172_v31 = vpop.permute.xlu0 %171 }
  0x9a   :  { %v167_v27 = vpop.permute.xlu1 %166 }
  0xf6   :  { %v1226_v37 = vpop.f32.mrb[0].mxu0 }
  0xf7   :  { %v1290_v38 = vpop.f32.mrb[0].mxu1  ;;  %v1227_v39 = vpop.f32.mrb[1].mxu0 }
  0xf8   :  { %v1228_v40 = vadd.f32 %v1227_v39, %v1226_v37  ;;  %v1291_v41 = vpop.f32.mrb[1].mxu1  ;;  %v1229_v42 = vpop.f32.mrb[2].mxu0 }
  0xf9   :  { %v1292_v43 = vadd.f32 %v1291_v41, %v1290_v38  ;;  %v1293_v44 = vpop.f32.mrb[2].mxu1  ;;  %v1230_v45 = vpop.f32.mrb[3].mxu0 }
  0xfa   :  { %v606_v46 = vadd.f32 %v1228_v40, %v142_v36  ;;  %v1231_v47 = vadd.f32 %v1230_v45, %v1229_v42  ;;  %v1294_v48 = vpop.f32.mrb[3].mxu1 }
  0xfb   :  { %v1295_v50 = vadd.f32 %v1294_v48, %v1293_v44  ;;  %v177_v48 = vpop.permute.xlu1 %176 }
  0xfc   :  { %v703_v51 = vadd.f32 %v1292_v43, %v606_v46  ;;  %v609_v52 = vadd.f32 %v1231_v47, %v147_v49 }
  0xfe   :  { %v706_v54 = vadd.f32 %v1295_v50, %v609_v52  ;;  %v1232_v55 = vpop.f32.mrb[4].mxu0  ;;  %v765_v58 = vmax.f32 %v703_v51, 0.0  ;;  %v182_v52 = vpop.permute.xlu0 %181 }
  0xff   :  { %v1296_v56 = vpop.f32.mrb[4].mxu1  ;;  %v1233_v57 = vpop.f32.mrb[5].mxu0 }
 0x100   :  { %v766_v59 = vmax.f32 %v706_v54, 0.0  ;;  %v1234_v60 = vadd.f32 %v1233_v57, %v1232_v55  ;;  %v1297_v61 = vpop.f32.mrb[5].mxu1  ;;  %v1235_v62 = vpop.f32.mrb[6].mxu0 }
 0x101   :  { %v1298_v63 = vadd.f32 %v1297_v61, %v1296_v56  ;;  %v1299_v0 = vpop.f32.mrb[6].mxu1  ;;  %v1236_v1 = vpop.f32.mrb[7].mxu0 }
 0x102   :  { %v614_v2 = vadd.f32 %v1234_v60, %v152_v53  ;;  %v1237_v3 = vadd.f32 %v1236_v1, %v1235_v62  ;;  %v1300_v4 = vpop.f32.mrb[7].mxu1  ;;  %v797_v5 = vpack.c.bf16 %v766_v59, %v765_v58 }
 0x103   :  { %v1301_v7 = vadd.f32 %v1300_v4, %v1299_v0 }
 0x104   :  { %v711_v8 = vadd.f32 %v1298_v63, %v614_v2  ;;  %v617_v9 = vadd.f32 %v1237_v3, %v157_v6  ;;  %1363 = vmatprep.subr.bf16.mxu0 %v797_v5 }
 0x105   :  { %1364 = vmatpush3.bf16.msra.mxu0 %v797_v5  ;;  %v187_v5 = vpop.permute.xlu1 %186 }
 0x106   :  { %v714_v11 = vadd.f32 %v1301_v7, %v617_v9  ;;  %v1238_v12 = vpop.f32.mrb[8].mxu0  ;;  %v767_v15 = vmax.f32 %v711_v8, 0.0  ;;  %v192_v9 = vpop.permute.xlu0 %191 }
 0x107   :  { %v1302_v13 = vpop.f32.mrb[8].mxu1  ;;  %v1239_v14 = vpop.f32.mrb[9].mxu0 }
 0x108   :  { %v768_v16 = vmax.f32 %v714_v11, 0.0  ;;  %v1240_v17 = vadd.f32 %v1239_v14, %v1238_v12  ;;  %v1303_v18 = vpop.f32.mrb[9].mxu1  ;;  %v1241_v19 = vpop.f32.mrb[10].mxu0 }
 0x109   :  { %v1304_v20 = vadd.f32 %v1303_v18, %v1302_v13  ;;  %v1305_v21 = vpop.f32.mrb[10].mxu1  ;;  %v1242_v22 = vpop.f32.mrb[11].mxu0 }
 0x10a   :  { %v622_v23 = vadd.f32 %v1240_v17, %v162_v10  ;;  %v1243_v24 = vadd.f32 %v1242_v22, %v1241_v19  ;;  %v1306_v25 = vpop.f32.mrb[11].mxu1  ;;  %v798_v26 = vpack.c.bf16 %v768_v16, %v767_v15 }
 0x10b   :  { %v1307_v28 = vadd.f32 %v1306_v25, %v1305_v21 }
 0x10c   :  { %v719_v29 = vadd.f32 %v1304_v20, %v622_v23  ;;  %v625_v30 = vadd.f32 %v1243_v24, %v167_v27  ;;  %1365 = vmatprep.subr.bf16.mxu0 %v798_v26 }
 0x10d   :  { %1366 = vmatpush3.bf16.msra.mxu0 %v798_v26  ;;  %v197_v26 = vpop.permute.xlu1 %196 }
 0x10e   :  { %v722_v32 = vadd.f32 %v1307_v28, %v625_v30  ;;  %v1244_v33 = vpop.f32.mrb[12].mxu0  ;;  %v769_v36 = vmax.f32 %v719_v29, 0.0  ;;  %v202_v30 = vpop.permute.xlu0 %201 }
 0x10f   :  { %v1308_v34 = vpop.f32.mrb[12].mxu1  ;;  %v1245_v35 = vpop.f32.mrb[13].mxu0 }
 0x110   :  { %v770_v37 = vmax.f32 %v722_v32, 0.0  ;;  %v1246_v38 = vadd.f32 %v1245_v35, %v1244_v33  ;;  %v1309_v39 = vpop.f32.mrb[13].mxu1  ;;  %v1247_v40 = vpop.f32.mrb[14].mxu0 }
 0x111   :  { %v1310_v41 = vadd.f32 %v1309_v39, %v1308_v34  ;;  %v1311_v42 = vpop.f32.mrb[14].mxu1  ;;  %v1248_v43 = vpop.f32.mrb[15].mxu0 }
 0x112   :  { %v630_v44 = vadd.f32 %v1246_v38, %v172_v31  ;;  %v1249_v45 = vadd.f32 %v1248_v43, %v1247_v40  ;;  %v1312_v46 = vpop.f32.mrb[15].mxu1  ;;  %v799_v47 = vpack.c.bf16 %v770_v37, %v769_v36 }
 0x113   :  { %v1313_v49 = vadd.f32 %v1312_v46, %v1311_v42 }
 0x114   :  { %v727_v50 = vadd.f32 %v1310_v41, %v630_v44  ;;  %v633_v51 = vadd.f32 %v1249_v45, %v177_v48  ;;  %1367 = vmatprep.subr.bf16.mxu0 %v799_v47 }
 0x115   :  { %1368 = vmatpush3.bf16.msra.mxu0 %v799_v47  ;;  %v207_v47 = vpop.permute.xlu1 %206 }
 0x116   :  { %v730_v53 = vadd.f32 %v1313_v49, %v633_v51  ;;  %v1250_v54 = vpop.f32.mrb[16].mxu0  ;;  %v771_v57 = vmax.f32 %v727_v50, 0.0  ;;  %v212_v51 = vpop.permute.xlu0 %211 }
 0x117   :  { %v1314_v55 = vpop.f32.mrb[16].mxu1  ;;  %v1251_v56 = vpop.f32.mrb[17].mxu0 }
 0x118   :  { %v772_v58 = vmax.f32 %v730_v53, 0.0  ;;  %v1252_v59 = vadd.f32 %v1251_v56, %v1250_v54  ;;  %v1315_v60 = vpop.f32.mrb[17].mxu1  ;;  %v1253_v61 = vpop.f32.mrb[18].mxu0 }
 0x119   :  { %v1316_v62 = vadd.f32 %v1315_v60, %v1314_v55  ;;  %v1317_v63 = vpop.f32.mrb[18].mxu1  ;;  %v1254_v0 = vpop.f32.mrb[19].mxu0 }
 0x11a   :  { %v638_v1 = vadd.f32 %v1252_v59, %v182_v52  ;;  %v1255_v2 = vadd.f32 %v1254_v0, %v1253_v61  ;;  %v1318_v3 = vpop.f32.mrb[19].mxu1  ;;  %v800_v4 = vpack.c.bf16 %v772_v58, %v771_v57 }
 0x11b   :  { %v1319_v6 = vadd.f32 %v1318_v3, %v1317_v63 }
 0x11c   :  { %v735_v7 = vadd.f32 %v1316_v62, %v638_v1  ;;  %v641_v8 = vadd.f32 %v1255_v2, %v187_v5  ;;  %1369 = vmatprep.subr.bf16.mxu0 %v800_v4 }
 0x11d   :  { %1370 = vmatpush3.bf16.msra.mxu0 %v800_v4  ;;  %v217_v4 = vpop.permute.xlu1 %216 }
 0x11e   :  { %v738_v10 = vadd.f32 %v1319_v6, %v641_v8  ;;  %v1256_v11 = vpop.f32.mrb[20].mxu0  ;;  %v773_v14 = vmax.f32 %v735_v7, 0.0 }
 0x11f   :  { %v1320_v12 = vpop.f32.mrb[20].mxu1  ;;  %v1257_v13 = vpop.f32.mrb[21].mxu0 }
 0x120   :  { %v774_v15 = vmax.f32 %v738_v10, 0.0  ;;  %v1258_v16 = vadd.f32 %v1257_v13, %v1256_v11  ;;  %v1321_v17 = vpop.f32.mrb[21].mxu1  ;;  %v1259_v18 = vpop.f32.mrb[22].mxu0  ;;  %v1502_v13 = vld [vmem:[%s1893_s3 + $0x10] sm:$0xff]  }
 0x121   :  { %v1322_v19 = vadd.f32 %v1321_v17, %v1320_v12  ;;  %v1323_v20 = vpop.f32.mrb[22].mxu1  ;;  %v1260_v21 = vpop.f32.mrb[23].mxu0  ;;  %v1501_v12 = vld [vmem:[%s1893_s3 + $0x8] sm:$0xff]   ;;  %v1506_v17 = vld [vmem:[%s1893_s3 + $0x30] sm:$0xff]  }
 0x122   :  { %v646_v22 = vadd.f32 %v1258_v16, %v192_v9  ;;  %v1261_v23 = vadd.f32 %v1260_v21, %v1259_v18  ;;  %v1324_v24 = vpop.f32.mrb[23].mxu1  ;;  %v801_v25 = vpack.c.bf16 %v774_v15, %v773_v14  ;;  %v1503_v14 = vld [vmem:[%s1893_s3 + $0x18] sm:$0xff]   ;;  %v1504_v15 = vld [vmem:[%s1893_s3 + $0x20] sm:$0xff]   ;;  %v1505_v16 = vld [vmem:[%s1893_s3 + $0x28] sm:$0xff]   ;;  %v829_v21 = vpop.permute.xlu1 %828 }
 0x123   :  { %v1325_v27 = vadd.f32 %v1324_v24, %v1323_v20  ;;  %v1507_v18 = vld [vmem:[%s1893_s3 + $0x38] sm:$0xff]   ;;  %v824_v20 = vpop.permute.xlu0 %823 }
 0x124   :  { %v743_v28 = vadd.f32 %v1322_v19, %v646_v22  ;;  %v649_v29 = vadd.f32 %v1261_v23, %v197_v26  ;;  %1371 = vmatprep.subr.bf16.mxu0 %v801_v25  ;;  %v1510_v19 = vmov 0.0  }
 0x125   :  { %1372 = vmatpush3.bf16.msra.mxu0 %v801_v25  ;;  %1395 = vmatprep.subr.bf16.mxu1 %v1510_v19 }
 0x126   :  { %v746_v31 = vadd.f32 %v1325_v27, %v649_v29  ;;  %v1262_v32 = vpop.f32.mrb[24].mxu0  ;;  %v775_v35 = vmax.f32 %v743_v28, 0.0  ;;  %1411 = vmatprep.mubr.msk.bf16.mxu1 %vm1511_vm0, %v1510_v19  ;;  %v839_v23 = vpop.permute.xlu1 %838 }
 0x127   :  { %v1326_v33 = vpop.f32.mrb[24].mxu1  ;;  %v1263_v34 = vpop.f32.mrb[25].mxu0 }
 0x128   :  { %v776_v36 = vmax.f32 %v746_v31, 0.0  ;;  %v1264_v37 = vadd.f32 %v1263_v34, %v1262_v32  ;;  %v1327_v38 = vpop.f32.mrb[25].mxu1  ;;  %v1265_v39 = vpop.f32.mrb[26].mxu0 }
 0x129   :  { %v1328_v40 = vadd.f32 %v1327_v38, %v1326_v33  ;;  %v1329_v41 = vpop.f32.mrb[26].mxu1  ;;  %v1266_v42 = vpop.f32.mrb[27].mxu0 }
 0x12a   :  { %v654_v43 = vadd.f32 %v1264_v37, %v202_v30  ;;  %v1267_v44 = vadd.f32 %v1266_v42, %v1265_v39  ;;  %v1330_v45 = vpop.f32.mrb[27].mxu1  ;;  %v802_v46 = vpack.c.bf16 %v776_v36, %v775_v35  ;;  %v834_v22 = vpop.permute.xlu0 %833 }
 0x12b   :  { %v1331_v48 = vadd.f32 %v1330_v45, %v1329_v41  ;;  %v849_v25 = vpop.permute.xlu1 %848 }
 0x12c   :  { %v751_v49 = vadd.f32 %v1328_v40, %v654_v43  ;;  %v657_v50 = vadd.f32 %v1267_v44, %v207_v47  ;;  %1373 = vmatprep.subr.bf16.mxu0 %v802_v46 }
 0x12d   :  { %1374 = vmatpush3.bf16.msra.mxu0 %v802_v46 }
 0x12e   :  { %v754_v52 = vadd.f32 %v1331_v48, %v657_v50  ;;  %v1268_v53 = vpop.f32.mrb[28].mxu0  ;;  %v777_v56 = vmax.f32 %v751_v49, 0.0  ;;  %v844_v24 = vpop.permute.xlu0 %843 }
 0x12f   :  { %v1332_v54 = vpop.f32.mrb[28].mxu1  ;;  %v1269_v55 = vpop.f32.mrb[29].mxu0 }
 0x130   :  { %v778_v57 = vmax.f32 %v754_v52, 0.0  ;;  %v1270_v58 = vadd.f32 %v1269_v55, %v1268_v53  ;;  %v1333_v59 = vpop.f32.mrb[29].mxu1  ;;  %v1271_v60 = vpop.f32.mrb[30].mxu0 }
 0x131   :  { %v1334_v61 = vadd.f32 %v1333_v59, %v1332_v54  ;;  %v1335_v62 = vpop.f32.mrb[30].mxu1  ;;  %v1272_v63 = vpop.f32.mrb[31].mxu0 }
 0x132   :  { %v662_v0 = vadd.f32 %v1270_v58, %v212_v51  ;;  %v1273_v1 = vadd.f32 %v1272_v63, %v1271_v60  ;;  %v1336_v2 = vpop.f32.mrb[31].mxu1  ;;  %v803_v3 = vpack.c.bf16 %v778_v57, %v777_v56  ;;  %v854_v26 = vpop.permute.xlu0 %853 }
 0x133   :  { %v1337_v5 = vadd.f32 %v1336_v2, %v1335_v62  ;;  %v859_v30 = vpop.permute.xlu1 %858 }
 0x134   :  { %v759_v6 = vadd.f32 %v1334_v61, %v662_v0  ;;  %v665_v7 = vadd.f32 %v1273_v1, %v217_v4  ;;  %1375 = vmatprep.subr.bf16.mxu0 %v803_v3 }
 0x135   :  { %1376 = vmatpush3.bf16.msra.mxu0 %v803_v3 }
 0x136   :  { %v762_v8 = vadd.f32 %v1337_v5, %v665_v7  ;;  %v779_v9 = vmax.f32 %v759_v6, 0.0  ;;  %v864_v38 = vpop.permute.xlu0 %863 }
 0x137   :  { %v869_v42 = vpop.permute.xlu1 %868 }
 0x138   :  { %v780_v10 = vmax.f32 %v762_v8, 0.0 }
 0x13a   :  { %v804_v11 = vpack.c.bf16 %v780_v10, %v779_v9  ;;  %v874_v51 = vpop.permute.xlu0 %873 }
 0x13b   :  { %v879_v55 = vpop.permute.xlu1 %878 }
 0x13c   :  { %1377 = vmatprep.subr.bf16.mxu0 %v804_v11 }
 0x13d   :  { %1378 = vmatpush3.bf16.msra.mxu0 %v804_v11 }
 0x13e   :  { %v884_v63 = vpop.permute.xlu0 %883 }
 0x13f   :  { %v889_v4 = vpop.permute.xlu1 %888 }
 0x140   :  { %1380 = vmatmul.mubr.bf16.vlgmr.msra.gmra.mrb[32].mxu0 %v1501_v12 }
 0x141   :  { %1383 = vmatprep.mubr.bf16.mxu0 %v1502_v13 }
 0x142   :  { %v894_v11 = vpop.permute.xlu0 %893 }
 0x148   :  { %1384 = vmatmul.mubr.bf16.gmra.mrb[36].mxu0 %v1503_v14 }
 0x149   :  { %1387 = vmatprep.mubr.bf16.mxu0 %v1504_v15 }
 0x150   :  { %1388 = vmatmul.mubr.bf16.gmra.mrb[40].mxu0 %v1505_v16  ;;  %v899_v16 = vpop.permute.xlu1 %898 }
 0x151   :  { %1391 = vmatprep.mubr.bf16.mxu0 %v1506_v17 }
 0x158   :  { %1392 = vmatmul.mubr.bf16.gmra.mrb[44].mxu0 %v1507_v18 }
 0x213   :  { %v1381_v27 = vpop.f32.mrb[32].mxu0 }
 0x214   :  { %v992_v28 = vadd.f32 %v1381_v27, %v834_v22  ;;  %v983_v29 = vpop.f32.mrb[33].mxu0 }
 0x215   :  { %v984_v31 = vadd.f32 %v983_v29, %v824_v20  ;;  %v1382_v32 = vpop.f32.mrb[34].mxu0  ;;  %v1508_v29 = vld [vmem:[%s1894_s5] sm:$0xff]  }
 0x216   :  { %v995_v33 = vadd.f32 %v1382_v32, %v839_v23  ;;  %v986_v34 = vpop.f32.mrb[35].mxu0  ;;  %v1048_v36 = vmax.f32 %v992_v28, 0.0 }
 0x217   :  { %v987_v35 = vadd.f32 %v986_v34, %v829_v21  ;;  %v1046_v39 = vmax.f32 %v984_v31, 0.0  ;;  %v1082_v34 = vpop.permute.xlu1 %1081 }
 0x218   :  { %v1049_v37 = vmax.f32 %v995_v33, 0.0 }
 0x219   :  { %v1047_v40 = vmax.f32 %v987_v35, 0.0 }
 0x21a   :  { %v1065_v41 = vpack.c.bf16 %v1049_v37, %v1048_v36 }
 0x21b   :  { %v1064_v43 = vpack.c.bf16 %v1047_v40, %v1046_v39  ;;  %v1385_v44 = vpop.f32.mrb[36].mxu0 }
 0x21c   :  { %v1008_v45 = vadd.f32 %v1385_v44, %v854_v26  ;;  %v999_v46 = vpop.f32.mrb[37].mxu0 }
 0x21d   :  { %v1000_v47 = vadd.f32 %v999_v46, %v844_v24  ;;  %v1386_v48 = vpop.f32.mrb[38].mxu0  ;;  %1396 = vmatpush3.bf16.msra.mxu1 %v1064_v43 }
 0x21e   :  { %v1011_v49 = vadd.f32 %v1386_v48, %v859_v30  ;;  %v1002_v50 = vpop.f32.mrb[39].mxu0  ;;  %1397 = vmatprep.subr.bf16.mxu1 %v1510_v19  ;;  %v1052_v53 = vmax.f32 %v1008_v45, 0.0  ;;  %v1077_v30 = vpop.permute.xlu0 %1076 }
 0x21f   :  { %v1003_v52 = vadd.f32 %v1002_v50, %v849_v25  ;;  %v1050_v56 = vmax.f32 %v1000_v47, 0.0 }
 0x220   :  { %v1053_v54 = vmax.f32 %v1011_v49, 0.0 }
 0x221   :  { %v1051_v57 = vmax.f32 %v1003_v52, 0.0  ;;  %1398 = vmatpush3.bf16.msra.mxu1 %v1065_v41 }
 0x222   :  { %v1067_v58 = vpack.c.bf16 %v1053_v54, %v1052_v53  ;;  %1399 = vmatprep.subr.bf16.mxu1 %v1510_v19 }
 0x223   :  { %v1066_v59 = vpack.c.bf16 %v1051_v57, %v1050_v56  ;;  %v1389_v60 = vpop.f32.mrb[40].mxu0 }
 0x224   :  { %v1024_v61 = vadd.f32 %v1389_v60, %v874_v51  ;;  %v1015_v62 = vpop.f32.mrb[41].mxu0 }
 0x225   :  { %v1016_v0 = vadd.f32 %v1015_v62, %v864_v38  ;;  %v1390_v1 = vpop.f32.mrb[42].mxu0  ;;  %1400 = vmatpush3.bf16.msra.mxu1 %v1066_v59 }
 0x226   :  { %v1027_v2 = vadd.f32 %v1390_v1, %v879_v55  ;;  %v1018_v3 = vpop.f32.mrb[43].mxu0  ;;  %1401 = vmatprep.subr.bf16.mxu1 %v1510_v19  ;;  %v1056_v6 = vmax.f32 %v1024_v61, 0.0 }
 0x227   :  { %v1019_v5 = vadd.f32 %v1018_v3, %v869_v42  ;;  %v1054_v8 = vmax.f32 %v1016_v0, 0.0 }
 0x228   :  { %v1057_v7 = vmax.f32 %v1027_v2, 0.0 }
 0x229   :  { %v1055_v9 = vmax.f32 %v1019_v5, 0.0  ;;  %1402 = vmatpush3.bf16.msra.mxu1 %v1067_v58 }
 0x22a   :  { %v1069_v10 = vpack.c.bf16 %v1057_v7, %v1056_v6  ;;  %1403 = vmatprep.subr.bf16.mxu1 %v1510_v19 }
 0x22b   :  { %v1068_v12 = vpack.c.bf16 %v1055_v9, %v1054_v8  ;;  %v1393_v13 = vpop.f32.mrb[44].mxu0 }
 0x22c   :  { %v1040_v14 = vadd.f32 %v1393_v13, %v894_v11  ;;  %v1031_v15 = vpop.f32.mrb[45].mxu0 }
 0x22d   :  { %v1032_v17 = vadd.f32 %v1031_v15, %v884_v63  ;;  %v1394_v18 = vpop.f32.mrb[46].mxu0  ;;  %1404 = vmatpush3.bf16.msra.mxu1 %v1068_v12 }
 0x22e   :  { %v1043_v20 = vadd.f32 %v1394_v18, %v899_v16  ;;  %v1034_v21 = vpop.f32.mrb[47].mxu0  ;;  %1405 = vmatprep.subr.bf16.mxu1 %v1510_v19  ;;  %v1060_v23 = vmax.f32 %v1040_v14, 0.0 }
 0x22f   :  { %v1035_v22 = vadd.f32 %v1034_v21, %v889_v4  ;;  %v1058_v25 = vmax.f32 %v1032_v17, 0.0 }
 0x230   :  { %v1061_v24 = vmax.f32 %v1043_v20, 0.0 }
 0x231   :  { %v1059_v26 = vmax.f32 %v1035_v22, 0.0  ;;  %1406 = vmatpush3.bf16.msra.mxu1 %v1069_v10 }
 0x232   :  { %v1071_v27 = vpack.c.bf16 %v1061_v24, %v1060_v23  ;;  %1407 = vmatprep.subr.bf16.mxu1 %v1510_v19 }
 0x233   :  { %v1070_v28 = vpack.c.bf16 %v1059_v26, %v1058_v25 }
 0x235   :  { %1408 = vmatpush3.bf16.msra.mxu1 %v1070_v28 }
 0x236   :  { %1409 = vmatprep.subr.bf16.mxu1 %v1510_v19 }
 0x239   :  { %1410 = vmatpush3.bf16.msra.mxu1 %v1071_v27 }
 0x23c   :  { %1412 = vmatmul.mubr.bf16.vlgmr.msra.gmra.mrb[32].mxu1 %v1508_v29 }
 0x30f   :  { %v1124_v31 = vpop.f32.mrb[32].mxu1 }
 0x310   :  { %v1125_v32 = vadd.f32 %v1124_v31, %v1077_v30  ;;  %v1413_v33 = vpop.f32.mrb[33].mxu1 }
 0x311   :  { %v1127_v35 = vpop.f32.mrb[34].mxu1 }
 0x312   :  { %1131 = vst [vmem:[%s1895_s7] sm:$0xff] %v1125_v32  ;;  %v1128_v36 = vadd.f32 %v1127_v35, %v1082_v34  ;;  %v1414_v37 = vpop.f32.mrb[35].mxu1 }
 0x314   :  { %1132 = vst [vmem:[%s1895_s7 + $0x8] sm:$0xff] %v1128_v36 }

</bundles_post_ra>
